<compile_context>
chip_gen: v7x
topology: tpu7x:2x2x1
jax: 0.10.0
libtpu: 0.0.40
codegen_flags: <defaults>
</compile_context>

<pallas_src>
import functools
import math

import jax
import jax.numpy as jnp
from jax import lax
from jax.experimental import pallas as pl
from jax.experimental.pallas import tpu as pltpu


# Packed small-parameter row indices (per layer).
ROW_BQ, ROW_BK, ROW_BV, ROW_BO = 0, 1, 2, 3
ROW_G1, ROW_BE1, ROW_G2, ROW_BE2 = 4, 5, 6, 7
ROW_B2, ROW_B1 = 8, 9
N_SMALL_ROWS = 10


# ---------------------------------------------------------------------------
# In-kernel helpers
# ---------------------------------------------------------------------------
def _layernorm(x, gamma, beta, eps=1e-5):
    mu = jnp.mean(x, axis=-1, keepdims=True)
    var = jnp.mean((x - mu) ** 2, axis=-1, keepdims=True)
    return (x - mu) * lax.rsqrt(var + eps) * gamma + beta


# ---------------------------------------------------------------------------
# Pallas kernel: one grid step == one decoder layer for one batch tile
# ---------------------------------------------------------------------------
def decoder_kernel(num_heads,
                   x_ref,          # (Bt, S, D) f32   embedding + PE
                   mask_ref,       # (S, S)     f32   additive causal mask (0 / -1e30)
                   wqkv_ref,       # (1, D, 3D) bf16  (1/sqrt(dh) folded into Q cols)
                   wo_ref,         # (1, D, D)  bf16
                   w1_ref,         # (1, D, F)  bf16
                   w2_ref,         # (1, F, D)  bf16
                   small_ref,      # (1, 10, W) f32   packed per-layer vectors
                   gf_ref, bf_ref,             # (1, D) f32  final LayerNorm
                   wf_ref, bfin_ref,           # (D, C) bf16, (1, C) f32
                   logits_ref,     # (Bt, S, C) f32   resident across L
                   attn_ref,       # (Bt, 1, S, S)    per-layer attention map
                   x_scr):         # VMEM (Bt, S, D) f32 residual carry
    l = pl.program_id(1)
    num_l = pl.num_programs(1)
    f32 = jnp.float32
    bf16 = jnp.bfloat16

    # Initialize the residual stream for this batch tile at the first layer.
    @pl.when(l == 0)
    def _():
        x_scr[...] = x_ref[...]

    x = x_scr[...]                                      # (Bt, S, D) f32
    Bt, S, D = x.shape
    H = num_heads
    dh = D // H
    F = w1_ref.shape[2]
    C = wf_ref.shape[1]
    M = Bt * S

    # Packed small per-layer params (one DMA); kept as (1, width) rows.
    sm = small_ref[0]                                   # (10, W) f32
    bq = sm[ROW_BQ:ROW_BQ + 1, :D]
    bk = sm[ROW_BK:ROW_BK + 1, :D]
    bv = sm[ROW_BV:ROW_BV + 1, :D]
    bo = sm[ROW_BO:ROW_BO + 1, :D]
    g1 = sm[ROW_G1:ROW_G1 + 1, :D]
    be1 = sm[ROW_BE1:ROW_BE1 + 1, :D]
    g2 = sm[ROW_G2:ROW_G2 + 1, :D]
    be2 = sm[ROW_BE2:ROW_BE2 + 1, :D]
    b2 = sm[ROW_B2:ROW_B2 + 1, :D]
    b1 = sm[ROW_B1:ROW_B1 + 1, :F]

    x2 = x.reshape(M, D)

    # ---- Pre-LN self-attention: fused QKV projection ------------------------
    xn = _layernorm(x2, g1, be1)                        # (M, D) f32
    qkv = jnp.dot(xn.astype(bf16), wqkv_ref[0],
                  preferred_element_type=f32)           # (M, 3D) f32
    q = (qkv[:, 0 * D:1 * D] + bq).reshape(Bt, S, D)    # scale already folded in
    k = (qkv[:, 1 * D:2 * D] + bk).reshape(Bt, S, D)
    v = (qkv[:, 2 * D:3 * D] + bv).reshape(Bt, S, D)

    mask = mask_ref[...]                                # (S, S) additive, resident

    # Per-head scores / softmax / PV (dh-wide matmuls are inherent to attention).
    # TODO(synk): for long sequences, tile the query axis with an online-softmax
    # inner loop so the (S, S) working set is bounded (needed for v7x 64 MiB).
    attn_sum = jnp.zeros((Bt, S, S), f32)
    ctx_parts = []
    for h in range(H):
        sl = slice(h * dh, (h + 1) * dh)
        qh = q[:, :, sl].astype(bf16)                   # (Bt, S, dh)
        kh = k[:, :, sl].astype(bf16)
        vh = v[:, :, sl].astype(bf16)
        sc = jnp.einsum('bqd,bkd->bqk', qh, kh,
                        preferred_element_type=f32) + mask     # (Bt, S, S)
        m = jnp.max(sc, axis=-1, keepdims=True)
        e = jnp.exp(sc - m)                             # f32 softmax (v5e-friendly)
        p = e * pl.reciprocal(jnp.sum(e, axis=-1, keepdims=True), approx=True)
        attn_sum = attn_sum + p
        ctx_parts.append(
            jnp.einsum('bqk,bkd->bqd', p.astype(bf16), vh,
                       preferred_element_type=f32))     # (Bt, S, dh)

    # PyTorch MHA returns attention probs averaged over heads.
    attn_ref[...] = (attn_sum * (1.0 / H)).astype(attn_ref.dtype).reshape(Bt, 1, S, S)

    # ---- fused output projection (full-K (D, D) matmul) ---------------------
    ctx = jnp.concatenate(ctx_parts, axis=-1).reshape(M, D)     # head-concat order
    attn_out = jnp.dot(ctx.astype(bf16), wo_ref[0],
                       preferred_element_type=f32) + bo
    x2 = x2 + attn_out

    # ---- Pre-LN feed-forward -------------------------------------------------
    xn2 = _layernorm(x2, g2, be2)
    h1 = jnp.dot(xn2.astype(bf16), w1_ref[0],
                 preferred_element_type=f32) + b1
    # TODO(synk): PyTorch nn.GELU() defaults to exact erf; tanh approximation used here.
    h1 = jax.nn.gelu(h1, approximate=True)
    ff = jnp.dot(h1.astype(bf16), w2_ref[0],
                 preferred_element_type=f32) + b2
    x2 = x2 + ff

    x_scr[...] = x2.reshape(Bt, S, D)                   # carry residual to next layer

    # ---- final LayerNorm + classification head at the last layer ------------
    # TODO(synk): for a large vocabulary C, hoist this head out of the kernel
    # (or tile it over C) instead of keeping (D, C) + (Bt, S, C) VMEM-resident.
    @pl.when(l == num_l - 1)
    def _():
        xf = _layernorm(x2, gf_ref[...], bf_ref[...])
        logits = jnp.dot(xf.astype(bf16), wf_ref[...],
                         preferred_element_type=f32) + bfin_ref[...]
        logits_ref[...] = logits.reshape(Bt, S, C)


# ---------------------------------------------------------------------------
# Host-side wrapper
# ---------------------------------------------------------------------------
def _round_up(n, m):
    return ((n + m - 1) // m) * m


def _pick_batch_tile(B, S):
    """Largest divisor of B keeping the matmul M dim (Bt*S) modest."""
    bt = 1
    for cand in range(1, B + 1):
        if B % cand == 0 and cand * S <= max(S, 1024):
            bt = cand
    return bt


def _vmem_limit_bytes(Bt, S, D, F, C, W):
    f32b, bf16b = 4, 2
    Dp, Fp, Cp, Sp, Wp = (_round_up(v, 128) for v in (D, F, C, S, W))
    S8 = _round_up(S, 8)
    M8 = _round_up(Bt * S, 8)
    # double-buffered per-layer weight blocks
    layer_w = 2 * ((D * 3 * Dp + D * Dp + D * Fp + F * Dp) * bf16b
                   + _round_up(N_SMALL_ROWS, 8) * Wp * f32b)
    # resident blocks: mask, final LN params, output head weights
    resident = S8 * Sp * f32b + 2 * 8 * Dp * f32b + D * Cp * bf16b + 8 * Cp * f32b
    # pipelined I/O blocks (x, logits, attn) + residual scratch
    io = 2 * Bt * S8 * Dp * f32b + 2 * Bt * S8 * Cp * f32b + 2 * Bt * S8 * Sp * bf16b
    scratch = Bt * S8 * Dp * f32b
    # activation temporaries (xn, qkv, q/k/v, ctx, ffn, per-head scores/probs)
    act = (M8 * (8 * Dp + 2 * Fp) * f32b
           + 5 * Bt * S8 * Sp * f32b
           + 3 * M8 * Dp * bf16b)
    est = layer_w + resident + io + scratch + act
    # Clamp: >=16 MiB for pipelining headroom, <=48 MiB so v7x (64 MiB) keeps slack.
    return int(min(48 * 2 ** 20, max(16 * 2 ** 20, int(1.5 * est) + (2 << 20))))


def decoder_forward(tokens, kp, num_heads, attn_dtype=jnp.bfloat16):
    B, S = tokens.shape
    emb = kp["embedding"]                               # (C, D) f32
    D = emb.shape[1]
    L = kp["wqkv"].shape[0]
    F = kp["w1"].shape[2]
    C = kp["w_final"].shape[1]
    W = kp["small"].shape[2]

    Bt = _pick_batch_tile(B, S)
    nbt = B // Bt

    # Glue outside the kernel: embedding gather + sinusoidal positional encoding.
    x = (emb[tokens] + kp["pe"][:S]).astype(jnp.float32)            # (B, S, D)
    # Additive causal mask, built once and kept VMEM-resident.
    rows = jnp.arange(S)[:, None]
    cols = jnp.arange(S)[None, :]
    mask = jnp.where(cols <= rows, 0.0, -1e30).astype(jnp.float32)  # (S, S)

    kernel = functools.partial(decoder_kernel, num_heads)

    def per_layer(rank):    # per-layer weights: block index l on the leading axis
        return lambda b, l: (l,) + (0,) * (rank - 1)

    def resident(rank):     # constant (resident) blocks
        return lambda b, l: (0,) * rank

    in_specs = [
        pl.BlockSpec((Bt, S, D), lambda b, l: (b, 0, 0)),        # x (emb + PE)
        pl.BlockSpec((S, S), resident(2)),                       # causal mask
        pl.BlockSpec((1, D, 3 * D), per_layer(3)),               # wqkv (scale folded)
        pl.BlockSpec((1, D, D), per_layer(3)),                   # wo
        pl.BlockSpec((1, D, F), per_layer(3)),                   # w1
        pl.BlockSpec((1, F, D), per_layer(3)),                   # w2
        pl.BlockSpec((1, N_SMALL_ROWS, W), per_layer(3)),        # packed small params
        pl.BlockSpec((1, D), resident(2)),                       # gamma_final
        pl.BlockSpec((1, D), resident(2)),                       # beta_final
        pl.BlockSpec((D, C), resident(2)),                       # w_final
        pl.BlockSpec((1, C), resident(2)),                       # b_final
    ]
    out_specs = (
        pl.BlockSpec((Bt, S, C), lambda b, l: (b, 0, 0)),        # logits (resident over L)
        pl.BlockSpec((Bt, 1, S, S), lambda b, l: (b, l, 0, 0)),  # per-layer attention map
    )
    out_shape = (
        jax.ShapeDtypeStruct((B, S, C), jnp.float32),
        jax.ShapeDtypeStruct((B, L, S, S), attn_dtype),
    )

    logits, attn = pl.pallas_call(
        kernel,
        grid=(nbt, L),
        in_specs=in_specs,
        out_specs=out_specs,
        out_shape=out_shape,
        scratch_shapes=[pltpu.VMEM((Bt, S, D), jnp.float32)],    # residual carry
        compiler_params=pltpu.CompilerParams(
            dimension_semantics=("parallel", "arbitrary"),
            vmem_limit_bytes=_vmem_limit_bytes(Bt, S, D, F, C, W)),
    )(x, mask, kp["wqkv"], kp["wo"], kp["w1"], kp["w2"], kp["small"],
      kp["gf"], kp["bf"], kp["w_final"], kp["b_final"])
    return logits, attn


# ---------------------------------------------------------------------------
# Parameter construction (PyTorch layout) + conversion to kernel layout
# ---------------------------------------------------------------------------
def make_positional_encoding(max_len, d_model):
    pos = jnp.arange(max_len, dtype=jnp.float32)[:, None]
    div = jnp.exp(jnp.arange(0, d_model, 2, dtype=jnp.float32)
                  * (-math.log(10000.0) / d_model))
    ang = pos * div
    pe = jnp.zeros((max_len, d_model), jnp.float32)
    pe = pe.at[:, 0::2].set(jnp.sin(ang))
    pe = pe.at[:, 1::2].set(jnp.cos(ang))
    return pe


def init_raw_params(key, num_layers, d_model, d_ff, num_classes, max_len):
    """Parameters in PyTorch layout (weight rows = output features)."""
    ks = jax.random.split(key, 11)
    s = 0.02
    L, D, F, C = num_layers, d_model, d_ff, num_classes
    return {
        "embedding": s * jax.random.normal(ks[0], (C, D), jnp.float32),
        "pe":        make_positional_encoding(max_len, D),
        "w_in":      s * jax.random.normal(ks[1], (L, 3 * D, D), jnp.float32),   # in_proj_weight
        "b_in":      s * jax.random.normal(ks[2], (L, 3 * D), jnp.float32),
        "w_out":     s * jax.random.normal(ks[3], (L, D, D), jnp.float32),       # out_proj.weight
        "b_out":     s * jax.random.normal(ks[4], (L, D), jnp.float32),
        "gamma1":    jnp.ones((L, D), jnp.float32),
        "beta1":     0.01 * jax.random.normal(ks[5], (L, D), jnp.float32),
        "gamma2":    jnp.ones((L, D), jnp.float32),
        "beta2":     0.01 * jax.random.normal(ks[6], (L, D), jnp.float32),
        "w1":        s * jax.random.normal(ks[7], (L, F, D), jnp.float32),       # Linear(D,F).weight
        "b1":        s * jax.random.normal(ks[8], (L, F), jnp.float32),
        "w2":        s * jax.random.normal(ks[9], (L, D, F), jnp.float32),       # Linear(F,D).weight
        "b2":        s * jax.random.normal(ks[10], (L, D), jnp.float32),
        "gamma_f":   jnp.ones((D,), jnp.float32),
        "beta_f":    jnp.zeros((D,), jnp.float32),
        "w_final":   s * jax.random.normal(ks[0], (C, D), jnp.float32),          # final_linear.weight
        "b_final":   jnp.zeros((C,), jnp.float32),
    }


def prepare_params(raw, num_heads):
    """Fused/transposed/scale-folded bf16 weights + packed small params."""
    L, threeD, D = raw["w_in"].shape
    F = raw["w1"].shape[1]
    H = num_heads
    dh = D // H
    scale = 1.0 / math.sqrt(dh)
    bf16 = jnp.bfloat16

    w_in_t = jnp.transpose(raw["w_in"], (0, 2, 1))          # (L, D, 3D): x @ W.T
    wqkv = jnp.concatenate(
        [w_in_t[:, :, 0 * D:1 * D] * scale,                 # fold 1/sqrt(dh) into Q
         w_in_t[:, :, 1 * D:2 * D],
         w_in_t[:, :, 2 * D:3 * D]], axis=-1).astype(bf16)  # (L, D, 3D)

    W = max(D, F)

    def row(v):
        return jnp.pad(v, ((0, 0), (0, W - v.shape[1])))

    small = jnp.stack([
        row(raw["b_in"][:, 0 * D:1 * D] * scale),           # bq (scaled)
        row(raw["b_in"][:, 1 * D:2 * D]),                   # bk
        row(raw["b_in"][:, 2 * D:3 * D]),                   # bv
        row(raw["b_out"]),                                   # bo
        row(raw["gamma1"]), row(raw["beta1"]),
        row(raw["gamma2"]), row(raw["beta2"]),
        row(raw["b2"]),                                      # b2
        row(raw["b1"]),                                      # b1 (width F)
    ], axis=1).astype(jnp.float32)                           # (L, 10, W)

    return {
        "embedding": raw["embedding"],
        "pe":        raw["pe"],
        "wqkv":      wqkv,                                                  # (L, D, 3D) bf16
        "wo":        jnp.transpose(raw["w_out"], (0, 2, 1)).astype(bf16),   # (L, D, D)
        "w1":        jnp.transpose(raw["w1"], (0, 2, 1)).astype(bf16),      # (L, D, F)
        "w2":        jnp.transpose(raw["w2"], (0, 2, 1)).astype(bf16),      # (L, F, D)
        "small":     small,
        "gf":        raw["gamma_f"].reshape(1, D),
        "bf":        raw["beta_f"].reshape(1, D),
        "w_final":   raw["w_final"].T.astype(bf16),                         # (D, C)
        "b_final":   raw["b_final"].reshape(1, -1),
    }


# ---------------------------------------------------------------------------
# Pure-JAX reference (same math / same bf16 cast discipline) for correctness
# ---------------------------------------------------------------------------
def reference_forward(tokens, kp, num_heads):
    B, S = tokens.shape
    D = kp["embedding"].shape[1]
    L = kp["wqkv"].shape[0]
    F = kp["w1"].shape[2]
    H = num_heads
    dh = D // H
    bf16, f32 = jnp.bfloat16, jnp.float32
    sm = kp["small"]

    def ln(v, g, b, eps=1e-5):
        mu = v.mean(-1, keepdims=True)
        var = ((v - mu) ** 2).mean(-1, keepdims=True)
        return (v - mu) / jnp.sqrt(var + eps) * g + b

    x = (kp["embedding"][tokens] + kp["pe"][:S]).astype(f32)
    rows = jnp.arange(S)[:, None]
    cols = jnp.arange(S)[None, :]
    mask = jnp.where(cols <= rows, 0.0, -1e30).astype(f32)

    attns = []
    for l in range(L):
        bq, bk, bv = sm[l, ROW_BQ, :D], sm[l, ROW_BK, :D], sm[l, ROW_BV, :D]
        bo = sm[l, ROW_BO, :D]
        g1, be1 = sm[l, ROW_G1, :D], sm[l, ROW_BE1, :D]
        g2, be2 = sm[l, ROW_G2, :D], sm[l, ROW_BE2, :D]
        b2, b1 = sm[l, ROW_B2, :D], sm[l, ROW_B1, :F]

        xn = ln(x, g1, be1)
        qkv = jnp.einsum('bsd,de->bse', xn.astype(bf16), kp["wqkv"][l],
                         preferred_element_type=f32)
        q = (qkv[..., 0 * D:1 * D] + bq).reshape(B, S, H, dh)
        k = (qkv[..., 1 * D:2 * D] + bk).reshape(B, S, H, dh)
        v = (qkv[..., 2 * D:3 * D] + bv).reshape(B, S, H, dh)
        sc = jnp.einsum('bqhd,bkhd->bhqk', q.astype(bf16), k.astype(bf16),
                        preferred_element_type=f32) + mask
        p = jax.nn.softmax(sc, axis=-1)
        attns.append(jnp.mean(p, axis=1))
        ctx = jnp.einsum('bhqk,bkhd->bqhd', p.astype(bf16), v.astype(bf16),
                         preferred_element_type=f32).reshape(B, S, D)
        out = jnp.einsum('bsd,de->bse', ctx.astype(bf16), kp["wo"][l],
                         preferred_element_type=f32) + bo
        x = x + out
        xn2 = ln(x, g2, be2)
        h1 = jnp.einsum('bsd,df->bsf', xn2.astype(bf16), kp["w1"][l],
                        preferred_element_type=f32) + b1
        h1 = jax.nn.gelu(h1, approximate=True)
        ff = jnp.einsum('bsf,fd->bsd', h1.astype(bf16), kp["w2"][l],
                        preferred_element_type=f32) + b2
        x = x + ff
    xf = ln(x, kp["gf"][0], kp["bf"][0])
    logits = jnp.einsum('bsd,dc->bsc', xf.astype(bf16), kp["w_final"],
                        preferred_element_type=f32) + kp["b_final"][0]
    return logits, jnp.stack(attns, axis=1)


# ---------------------------------------------------------------------------
if __name__ == "__main__":
    num_layers, d_model, num_heads, d_ff = 2, 32, 2, 64
    num_classes, max_len = 16, 16
    B, S = 2, 8

    root = jax.random.PRNGKey(0)
    k_params, k_tok = jax.random.split(root)
    raw = init_raw_params(k_params, num_layers, d_model, d_ff, num_classes, max_len)
    kp = prepare_params(raw, num_heads)
    tokens = jax.random.randint(k_tok, (B, S), 0, num_classes, dtype=jnp.int32)

    logits, attn = decoder_forward(tokens, kp, num_heads)
    jax.block_until_ready((logits, attn))

    ref_logits, ref_attn = reference_forward(tokens, kp, num_heads)
    assert logits.shape == (B, S, num_classes)
    assert attn.shape == (B, num_layers, S, S)
    assert jnp.allclose(logits, ref_logits, atol=1e-2, rtol=1e-2), \
        float(jnp.max(jnp.abs(logits - ref_logits)))
    assert jnp.allclose(attn.astype(jnp.float32), ref_attn, atol=1e-2, rtol=1e-2), \
        float(jnp.max(jnp.abs(attn.astype(jnp.float32) - ref_attn)))

    print("KERNEL_OK")
</pallas_src>

<mosaic_0001>
module attributes {stable_mosaic.version = 11 : i64} {
  func.func @decoder_kernel(%arg0: i32, %arg1: i32, %arg2: memref<2x8x32xf32, #tpu.memory_space<vmem>>, %arg3: memref<8x8xf32, #tpu.memory_space<vmem>>, %arg4: memref<1x32x96xbf16, #tpu.memory_space<vmem>>, %arg5: memref<1x32x32xbf16, #tpu.memory_space<vmem>>, %arg6: memref<1x32x64xbf16, #tpu.memory_space<vmem>>, %arg7: memref<1x64x32xbf16, #tpu.memory_space<vmem>>, %arg8: memref<1x10x64xf32, #tpu.memory_space<vmem>>, %arg9: memref<1x32xf32, #tpu.memory_space<vmem>>, %arg10: memref<1x32xf32, #tpu.memory_space<vmem>>, %arg11: memref<32x16xbf16, #tpu.memory_space<vmem>>, %arg12: memref<1x16xf32, #tpu.memory_space<vmem>>, %arg13: memref<2x8x16xf32, #tpu.memory_space<vmem>>, %arg14: memref<2x1x8x8xbf16, #tpu.memory_space<vmem>>, %arg15: memref<2x8x32xf32, #tpu.memory_space<vmem>>) attributes {dimension_semantics = [#tpu.dimension_semantics<parallel>, #tpu.dimension_semantics<arbitrary>], iteration_bounds = array<i64: 1, 2>, scalar_prefetch = 0 : i64, scratch_operands = 1 : i64, tpu.core_type = #tpu.core_type<tc>, window_params = [{transform_indices = @transform_0, window_bounds = array<i64: 2, 8, 32>}, {pipeline_mode = #tpu.pipeline_mode<synchronous>, transform_indices = @transform_1, window_bounds = array<i64: 8, 8>}, {transform_indices = @transform_2, window_bounds = array<i64: 1, 32, 96>}, {transform_indices = @transform_3, window_bounds = array<i64: 1, 32, 32>}, {transform_indices = @transform_4, window_bounds = array<i64: 1, 32, 64>}, {transform_indices = @transform_5, window_bounds = array<i64: 1, 64, 32>}, {transform_indices = @transform_6, window_bounds = array<i64: 1, 10, 64>}, {pipeline_mode = #tpu.pipeline_mode<synchronous>, transform_indices = @transform_7, window_bounds = array<i64: 1, 32>}, {pipeline_mode = #tpu.pipeline_mode<synchronous>, transform_indices = @transform_8, window_bounds = array<i64: 1, 32>}, {pipeline_mode = #tpu.pipeline_mode<synchronous>, transform_indices = @transform_9, window_bounds = array<i64: 32, 16>}, {pipeline_mode = #tpu.pipeline_mode<synchronous>, transform_indices = @transform_10, window_bounds = array<i64: 1, 16>}, {transform_indices = @transform_11, window_bounds = array<i64: 2, 8, 16>}, {transform_indices = @transform_12, window_bounds = array<i64: 2, 1, 8, 8>}]} {
    %c0_i32 = arith.constant 0 : i32
    %0 = arith.cmpi eq, %arg1, %c0_i32 : i32
    %1 = arith.extui %0 : i1 to i32
    %c0_i32_0 = arith.constant 0 : i32
    %2 = arith.cmpi ne, %1, %c0_i32_0 : i32
    scf.if %2 {
      %c0_55 = arith.constant 0 : index
      %c0_56 = arith.constant 0 : index
      %c0_57 = arith.constant 0 : index
      %170 = vector.load %arg2[%c0_55, %c0_56, %c0_57] : memref<2x8x32xf32, #tpu.memory_space<vmem>>, vector<2x8x32xf32>
      %c0_58 = arith.constant 0 : index
      %c0_59 = arith.constant 0 : index
      %c0_60 = arith.constant 0 : index
      %171 = vector.load %arg15[%c0_58, %c0_59, %c0_60] : memref<2x8x32xf32, #tpu.memory_space<vmem>>, vector<2x8x32xf32>
      tpu.vector_store %arg15[%c0_58, %c0_59, %c0_60], %170 {strides = array<i32>} : memref<2x8x32xf32, #tpu.memory_space<vmem>>, vector<2x8x32xf32>,
    } else {
    }
    %c0 = arith.constant 0 : index
    %c0_1 = arith.constant 0 : index
    %c0_2 = arith.constant 0 : index
    %3 = vector.load %arg15[%c0, %c0_1, %c0_2] : memref<2x8x32xf32, #tpu.memory_space<vmem>>, vector<2x8x32xf32>
    %c0_3 = arith.constant 0 : index
    %c0_4 = arith.constant 0 : index
    %c0_5 = arith.constant 0 : index
    %4 = vector.load %arg8[%c0_3, %c0_4, %c0_5] : memref<1x10x64xf32, #tpu.memory_space<vmem>>, vector<1x10x64xf32>
    %5 = vector.shape_cast %4 : vector<1x10x64xf32> to vector<10x64xf32>
    %6 = vector.extract_strided_slice %5 {offsets = [0, 0], sizes = [1, 32], strides = [1, 1]} : vector<10x64xf32> to vector<1x32xf32>
    %7 = vector.extract_strided_slice %5 {offsets = [1, 0], sizes = [1, 32], strides = [1, 1]} : vector<10x64xf32> to vector<1x32xf32>
    %8 = vector.extract_strided_slice %5 {offsets = [2, 0], sizes = [1, 32], strides = [1, 1]} : vector<10x64xf32> to vector<1x32xf32>
    %9 = vector.extract_strided_slice %5 {offsets = [3, 0], sizes = [1, 32], strides = [1, 1]} : vector<10x64xf32> to vector<1x32xf32>
    %10 = vector.extract_strided_slice %5 {offsets = [4, 0], sizes = [1, 32], strides = [1, 1]} : vector<10x64xf32> to vector<1x32xf32>
    %11 = vector.extract_strided_slice %5 {offsets = [5, 0], sizes = [1, 32], strides = [1, 1]} : vector<10x64xf32> to vector<1x32xf32>
    %12 = vector.extract_strided_slice %5 {offsets = [6, 0], sizes = [1, 32], strides = [1, 1]} : vector<10x64xf32> to vector<1x32xf32>
    %13 = vector.extract_strided_slice %5 {offsets = [7, 0], sizes = [1, 32], strides = [1, 1]} : vector<10x64xf32> to vector<1x32xf32>
    %14 = vector.extract_strided_slice %5 {offsets = [8, 0], sizes = [1, 32], strides = [1, 1]} : vector<10x64xf32> to vector<1x32xf32>
    %15 = vector.extract_strided_slice %5 {offsets = [9, 0], sizes = [1, 64], strides = [1, 1]} : vector<10x64xf32> to vector<1x64xf32>
    %16 = vector.shape_cast %3 : vector<2x8x32xf32> to vector<16x32xf32>
    %cst = arith.constant dense<0.000000e+00> : vector<16xf32>
    %17 = vector.multi_reduction <add>, %16, %cst [1] : vector<16x32xf32> to vector<16xf32>
    %18 = vector.shape_cast %17 : vector<16xf32> to vector<16x1xf32>
    %cst_6 = arith.constant 3.200000e+01 : f32
    %19 = vector.broadcast %cst_6 : f32 to vector<16x1xf32>
    %20 = arith.divf %18, %19 : vector<16x1xf32>
    %21 = vector.broadcast %20 : vector<16x1xf32> to vector<16x32xf32>
    %22 = arith.subf %16, %21 : vector<16x32xf32>
    %23 = arith.mulf %22, %22 : vector<16x32xf32>
    %cst_7 = arith.constant dense<0.000000e+00> : vector<16xf32>
    %24 = vector.multi_reduction <add>, %23, %cst_7 [1] : vector<16x32xf32> to vector<16xf32>
    %25 = vector.shape_cast %24 : vector<16xf32> to vector<16x1xf32>
    %cst_8 = arith.constant 3.200000e+01 : f32
    %26 = vector.broadcast %cst_8 : f32 to vector<16x1xf32>
    %27 = arith.divf %25, %26 : vector<16x1xf32>
    %28 = vector.broadcast %20 : vector<16x1xf32> to vector<16x32xf32>
    %29 = arith.subf %16, %28 : vector<16x32xf32>
    %cst_9 = arith.constant 9.99999974E-6 : f32
    %30 = vector.broadcast %cst_9 : f32 to vector<16x1xf32>
    %31 = arith.addf %27, %30 : vector<16x1xf32>
    %32 = math.rsqrt %31 : vector<16x1xf32>
    %33 = vector.broadcast %32 : vector<16x1xf32> to vector<16x32xf32>
    %34 = arith.mulf %29, %33 : vector<16x32xf32>
    %35 = vector.broadcast %10 : vector<1x32xf32> to vector<16x32xf32>
    %36 = arith.mulf %34, %35 : vector<16x32xf32>
    %37 = vector.broadcast %11 : vector<1x32xf32> to vector<16x32xf32>
    %38 = arith.addf %36, %37 : vector<16x32xf32>
    %39 = arith.truncf %38 : vector<16x32xf32> to vector<16x32xbf16>
    %c0_10 = arith.constant 0 : index
    %c0_11 = arith.constant 0 : index
    %c0_12 = arith.constant 0 : index
    %40 = vector.load %arg4[%c0_10, %c0_11, %c0_12] : memref<1x32x96xbf16, #tpu.memory_space<vmem>>, vector<1x32x96xbf16>
    %41 = vector.shape_cast %40 : vector<1x32x96xbf16> to vector<32x96xbf16>
    %cst_13 = arith.constant dense<0.000000e+00> : vector<16x96xf32>
    %42 = tpu.matmul %39, %41, %cst_13 {dimension_numbers = #tpu.dot_dimension_numbers<[1], [0], [0], [1], [0, 0, 1, 1], [], []>} : vector<16x32xbf16>, vector<32x96xbf16>, vector<16x96xf32> -> vector<16x96xf32>
    %43 = vector.extract_strided_slice %42 {offsets = [0, 0], sizes = [16, 32], strides = [1, 1]} : vector<16x96xf32> to vector<16x32xf32>
    %44 = vector.broadcast %6 : vector<1x32xf32> to vector<16x32xf32>
    %45 = arith.addf %43, %44 : vector<16x32xf32>
    %46 = vector.shape_cast %45 : vector<16x32xf32> to vector<2x8x32xf32>
    %47 = vector.extract_strided_slice %42 {offsets = [0, 32], sizes = [16, 32], strides = [1, 1]} : vector<16x96xf32> to vector<16x32xf32>
    %48 = vector.broadcast %7 : vector<1x32xf32> to vector<16x32xf32>
    %49 = arith.addf %47, %48 : vector<16x32xf32>
    %50 = vector.shape_cast %49 : vector<16x32xf32> to vector<2x8x32xf32>
    %51 = vector.extract_strided_slice %42 {offsets = [0, 64], sizes = [16, 32], strides = [1, 1]} : vector<16x96xf32> to vector<16x32xf32>
    %52 = vector.broadcast %8 : vector<1x32xf32> to vector<16x32xf32>
    %53 = arith.addf %51, %52 : vector<16x32xf32>
    %54 = vector.shape_cast %53 : vector<16x32xf32> to vector<2x8x32xf32>
    %c0_14 = arith.constant 0 : index
    %c0_15 = arith.constant 0 : index
    %55 = vector.load %arg3[%c0_14, %c0_15] : memref<8x8xf32, #tpu.memory_space<vmem>>, vector<8x8xf32>
    %cst_16 = arith.constant 0.000000e+00 : f32
    %56 = vector.broadcast %cst_16 : f32 to vector<2x8x8xf32>
    %57 = vector.extract_strided_slice %46 {offsets = [0, 0, 0], sizes = [2, 8, 16], strides = [1, 1, 1]} : vector<2x8x32xf32> to vector<2x8x16xf32>
    %58 = arith.truncf %57 : vector<2x8x16xf32> to vector<2x8x16xbf16>
    %59 = vector.extract_strided_slice %50 {offsets = [0, 0, 0], sizes = [2, 8, 16], strides = [1, 1, 1]} : vector<2x8x32xf32> to vector<2x8x16xf32>
    %60 = arith.truncf %59 : vector<2x8x16xf32> to vector<2x8x16xbf16>
    %61 = vector.extract_strided_slice %54 {offsets = [0, 0, 0], sizes = [2, 8, 16], strides = [1, 1, 1]} : vector<2x8x32xf32> to vector<2x8x16xf32>
    %62 = arith.truncf %61 : vector<2x8x16xf32> to vector<2x8x16xbf16>
    "tpu.trace_start"() <{level = 10 : i32, message = "bqd,bkd->bqk"}> : () -> ()
    %cst_17 = arith.constant dense<0.000000e+00> : vector<2x8x8xf32>
    %63 = tpu.matmul %58, %60, %cst_17 {dimension_numbers = #tpu.dot_dimension_numbers<[2], [2], [1], [1], [0, 0, 0, 1, 1, 1], [0], [0]>} : vector<2x8x16xbf16>, vector<2x8x16xbf16>, vector<2x8x8xf32> -> vector<2x8x8xf32>
    "tpu.trace_stop"() : () -> ()
    %64 = vector.shape_cast %55 : vector<8x8xf32> to vector<1x8x8xf32>
    %65 = vector.broadcast %64 : vector<1x8x8xf32> to vector<2x8x8xf32>
    %66 = arith.addf %63, %65 : vector<2x8x8xf32>
    %cst_18 = arith.constant dense<0xFF800000> : vector<2x8xf32>
    %67 = vector.multi_reduction <maximumf>, %66, %cst_18 [2] : vector<2x8x8xf32> to vector<2x8xf32>
    %68 = vector.shape_cast %67 : vector<2x8xf32> to vector<2x8x1xf32>
    %69 = vector.broadcast %68 : vector<2x8x1xf32> to vector<2x8x8xf32>
    %70 = arith.subf %66, %69 : vector<2x8x8xf32>
    %71 = math.exp %70 : vector<2x8x8xf32>
    %cst_19 = arith.constant dense<0.000000e+00> : vector<2x8xf32>
    %72 = vector.multi_reduction <add>, %71, %cst_19 [2] : vector<2x8x8xf32> to vector<2x8xf32>
    %73 = vector.shape_cast %72 : vector<2x8xf32> to vector<2x8x1xf32>
    %74 = tpu.reciprocal %73 {approx = true} : vector<2x8x1xf32> -> vector<2x8x1xf32>
    %75 = vector.broadcast %74 : vector<2x8x1xf32> to vector<2x8x8xf32>
    %76 = arith.mulf %71, %75 : vector<2x8x8xf32>
    %77 = arith.addf %56, %76 : vector<2x8x8xf32>
    %78 = arith.truncf %76 : vector<2x8x8xf32> to vector<2x8x8xbf16>
    "tpu.trace_start"() <{level = 10 : i32, message = "bqk,bkd->bqd"}> : () -> ()
    %cst_20 = arith.constant dense<0.000000e+00> : vector<2x8x16xf32>
    %79 = tpu.matmul %78, %62, %cst_20 {dimension_numbers = #tpu.dot_dimension_numbers<[2], [1], [1], [2], [0, 0, 0, 1, 1, 2], [0], [0]>} : vector<2x8x8xbf16>, vector<2x8x16xbf16>, vector<2x8x16xf32> -> vector<2x8x16xf32>
    "tpu.trace_stop"() : () -> ()
    %80 = vector.extract_strided_slice %46 {offsets = [0, 0, 16], sizes = [2, 8, 16], strides = [1, 1, 1]} : vector<2x8x32xf32> to vector<2x8x16xf32>
    %81 = arith.truncf %80 : vector<2x8x16xf32> to vector<2x8x16xbf16>
    %82 = vector.extract_strided_slice %50 {offsets = [0, 0, 16], sizes = [2, 8, 16], strides = [1, 1, 1]} : vector<2x8x32xf32> to vector<2x8x16xf32>
    %83 = arith.truncf %82 : vector<2x8x16xf32> to vector<2x8x16xbf16>
    %84 = vector.extract_strided_slice %54 {offsets = [0, 0, 16], sizes = [2, 8, 16], strides = [1, 1, 1]} : vector<2x8x32xf32> to vector<2x8x16xf32>
    %85 = arith.truncf %84 : vector<2x8x16xf32> to vector<2x8x16xbf16>
    "tpu.trace_start"() <{level = 10 : i32, message = "bqd,bkd->bqk"}> : () -> ()
    %cst_21 = arith.constant dense<0.000000e+00> : vector<2x8x8xf32>
    %86 = tpu.matmul %81, %83, %cst_21 {dimension_numbers = #tpu.dot_dimension_numbers<[2], [2], [1], [1], [0, 0, 0, 1, 1, 1], [0], [0]>} : vector<2x8x16xbf16>, vector<2x8x16xbf16>, vector<2x8x8xf32> -> vector<2x8x8xf32>
    "tpu.trace_stop"() : () -> ()
    %87 = vector.shape_cast %55 : vector<8x8xf32> to vector<1x8x8xf32>
    %88 = vector.broadcast %87 : vector<1x8x8xf32> to vector<2x8x8xf32>
    %89 = arith.addf %86, %88 : vector<2x8x8xf32>
    %cst_22 = arith.constant dense<0xFF800000> : vector<2x8xf32>
    %90 = vector.multi_reduction <maximumf>, %89, %cst_22 [2] : vector<2x8x8xf32> to vector<2x8xf32>
    %91 = vector.shape_cast %90 : vector<2x8xf32> to vector<2x8x1xf32>
    %92 = vector.broadcast %91 : vector<2x8x1xf32> to vector<2x8x8xf32>
    %93 = arith.subf %89, %92 : vector<2x8x8xf32>
    %94 = math.exp %93 : vector<2x8x8xf32>
    %cst_23 = arith.constant dense<0.000000e+00> : vector<2x8xf32>
    %95 = vector.multi_reduction <add>, %94, %cst_23 [2] : vector<2x8x8xf32> to vector<2x8xf32>
    %96 = vector.shape_cast %95 : vector<2x8xf32> to vector<2x8x1xf32>
    %97 = tpu.reciprocal %96 {approx = true} : vector<2x8x1xf32> -> vector<2x8x1xf32>
    %98 = vector.broadcast %97 : vector<2x8x1xf32> to vector<2x8x8xf32>
    %99 = arith.mulf %94, %98 : vector<2x8x8xf32>
    %100 = arith.addf %77, %99 : vector<2x8x8xf32>
    %101 = arith.truncf %99 : vector<2x8x8xf32> to vector<2x8x8xbf16>
    "tpu.trace_start"() <{level = 10 : i32, message = "bqk,bkd->bqd"}> : () -> ()
    %cst_24 = arith.constant dense<0.000000e+00> : vector<2x8x16xf32>
    %102 = tpu.matmul %101, %85, %cst_24 {dimension_numbers = #tpu.dot_dimension_numbers<[2], [1], [1], [2], [0, 0, 0, 1, 1, 2], [0], [0]>} : vector<2x8x8xbf16>, vector<2x8x16xbf16>, vector<2x8x16xf32> -> vector<2x8x16xf32>
    "tpu.trace_stop"() : () -> ()
    %cst_25 = arith.constant 5.000000e-01 : f32
    %103 = vector.broadcast %cst_25 : f32 to vector<2x8x8xf32>
    %104 = arith.mulf %100, %103 : vector<2x8x8xf32>
    %105 = arith.truncf %104 : vector<2x8x8xf32> to vector<2x8x8xbf16>
    %106 = vector.shape_cast %105 : vector<2x8x8xbf16> to vector<2x1x8x8xbf16>
    %c0_26 = arith.constant 0 : index
    %c0_27 = arith.constant 0 : index
    %c0_28 = arith.constant 0 : index
    %c0_29 = arith.constant 0 : index
    %107 = vector.load %arg14[%c0_26, %c0_27, %c0_28, %c0_29] : memref<2x1x8x8xbf16, #tpu.memory_space<vmem>>, vector<2x1x8x8xbf16>
    tpu.vector_store %arg14[%c0_26, %c0_27, %c0_28, %c0_29], %106 {strides = array<i32>} : memref<2x1x8x8xbf16, #tpu.memory_space<vmem>>, vector<2x1x8x8xbf16>,
    %108 = tpu.concatenate %79, %102 in 2 : vector<2x8x16xf32>, vector<2x8x16xf32> -> vector<2x8x32xf32>
    %109 = vector.shape_cast %108 : vector<2x8x32xf32> to vector<16x32xf32>
    %110 = arith.truncf %109 : vector<16x32xf32> to vector<16x32xbf16>
    %c0_30 = arith.constant 0 : index
    %c0_31 = arith.constant 0 : index
    %c0_32 = arith.constant 0 : index
    %111 = vector.load %arg5[%c0_30, %c0_31, %c0_32] : memref<1x32x32xbf16, #tpu.memory_space<vmem>>, vector<1x32x32xbf16>
    %112 = vector.shape_cast %111 : vector<1x32x32xbf16> to vector<32x32xbf16>
    %cst_33 = arith.constant dense<0.000000e+00> : vector<16x32xf32>
    %113 = tpu.matmul %110, %112, %cst_33 {dimension_numbers = #tpu.dot_dimension_numbers<[1], [0], [0], [1], [0, 0, 1, 1], [], []>} : vector<16x32xbf16>, vector<32x32xbf16>, vector<16x32xf32> -> vector<16x32xf32>
    %114 = vector.broadcast %9 : vector<1x32xf32> to vector<16x32xf32>
    %115 = arith.addf %113, %114 : vector<16x32xf32>
    %116 = arith.addf %16, %115 : vector<16x32xf32>
    %cst_34 = arith.constant dense<0.000000e+00> : vector<16xf32>
    %117 = vector.multi_reduction <add>, %116, %cst_34 [1] : vector<16x32xf32> to vector<16xf32>
    %118 = vector.shape_cast %117 : vector<16xf32> to vector<16x1xf32>
    %cst_35 = arith.constant 3.200000e+01 : f32
    %119 = vector.broadcast %cst_35 : f32 to vector<16x1xf32>
    %120 = arith.divf %118, %119 : vector<16x1xf32>
    %121 = vector.broadcast %120 : vector<16x1xf32> to vector<16x32xf32>
    %122 = arith.subf %116, %121 : vector<16x32xf32>
    %123 = arith.mulf %122, %122 : vector<16x32xf32>
    %cst_36 = arith.constant dense<0.000000e+00> : vector<16xf32>
    %124 = vector.multi_reduction <add>, %123, %cst_36 [1] : vector<16x32xf32> to vector<16xf32>
    %125 = vector.shape_cast %124 : vector<16xf32> to vector<16x1xf32>
    %cst_37 = arith.constant 3.200000e+01 : f32
    %126 = vector.broadcast %cst_37 : f32 to vector<16x1xf32>
    %127 = arith.divf %125, %126 : vector<16x1xf32>
    %128 = vector.broadcast %120 : vector<16x1xf32> to vector<16x32xf32>
    %129 = arith.subf %116, %128 : vector<16x32xf32>
    %cst_38 = arith.constant 9.99999974E-6 : f32
    %130 = vector.broadcast %cst_38 : f32 to vector<16x1xf32>
    %131 = arith.addf %127, %130 : vector<16x1xf32>
    %132 = math.rsqrt %131 : vector<16x1xf32>
    %133 = vector.broadcast %132 : vector<16x1xf32> to vector<16x32xf32>
    %134 = arith.mulf %129, %133 : vector<16x32xf32>
    %135 = vector.broadcast %12 : vector<1x32xf32> to vector<16x32xf32>
    %136 = arith.mulf %134, %135 : vector<16x32xf32>
    %137 = vector.broadcast %13 : vector<1x32xf32> to vector<16x32xf32>
    %138 = arith.addf %136, %137 : vector<16x32xf32>
    %139 = arith.truncf %138 : vector<16x32xf32> to vector<16x32xbf16>
    %c0_39 = arith.constant 0 : index
    %c0_40 = arith.constant 0 : index
    %c0_41 = arith.constant 0 : index
    %140 = vector.load %arg6[%c0_39, %c0_40, %c0_41] : memref<1x32x64xbf16, #tpu.memory_space<vmem>>, vector<1x32x64xbf16>
    %141 = vector.shape_cast %140 : vector<1x32x64xbf16> to vector<32x64xbf16>
    %cst_42 = arith.constant dense<0.000000e+00> : vector<16x64xf32>
    %142 = tpu.matmul %139, %141, %cst_42 {dimension_numbers = #tpu.dot_dimension_numbers<[1], [0], [0], [1], [0, 0, 1, 1], [], []>} : vector<16x32xbf16>, vector<32x64xbf16>, vector<16x64xf32> -> vector<16x64xf32>
    %143 = vector.broadcast %15 : vector<1x64xf32> to vector<16x64xf32>
    %144 = arith.addf %142, %143 : vector<16x64xf32>
    %145 = arith.mulf %144, %144 : vector<16x64xf32>
    %146 = arith.mulf %144, %145 : vector<16x64xf32>
    %cst_43 = arith.constant 4.471500e-02 : f32
    %147 = vector.broadcast %cst_43 : f32 to vector<16x64xf32>
    %148 = arith.mulf %147, %146 : vector<16x64xf32>
    %149 = arith.addf %144, %148 : vector<16x64xf32>
    %cst_44 = arith.constant 0.797884583 : f32
    %150 = vector.broadcast %cst_44 : f32 to vector<16x64xf32>
    %151 = arith.mulf %150, %149 : vector<16x64xf32>
    %152 = math.tanh %151 : vector<16x64xf32>
    %cst_45 = arith.constant 1.000000e+00 : f32
    %153 = vector.broadcast %cst_45 : f32 to vector<16x64xf32>
    %154 = arith.addf %153, %152 : vector<16x64xf32>
    %cst_46 = arith.constant 5.000000e-01 : f32
    %155 = vector.broadcast %cst_46 : f32 to vector<16x64xf32>
    %156 = arith.mulf %155, %154 : vector<16x64xf32>
    %157 = arith.mulf %144, %156 : vector<16x64xf32>
    %158 = arith.truncf %157 : vector<16x64xf32> to vector<16x64xbf16>
    %c0_47 = arith.constant 0 : index
    %c0_48 = arith.constant 0 : index
    %c0_49 = arith.constant 0 : index
    %159 = vector.load %arg7[%c0_47, %c0_48, %c0_49] : memref<1x64x32xbf16, #tpu.memory_space<vmem>>, vector<1x64x32xbf16>
    %160 = vector.shape_cast %159 : vector<1x64x32xbf16> to vector<64x32xbf16>
    %cst_50 = arith.constant dense<0.000000e+00> : vector<16x32xf32>
    %161 = tpu.matmul %158, %160, %cst_50 {dimension_numbers = #tpu.dot_dimension_numbers<[1], [0], [0], [1], [0, 0, 1, 1], [], []>} : vector<16x64xbf16>, vector<64x32xbf16>, vector<16x32xf32> -> vector<16x32xf32>
    %162 = vector.broadcast %14 : vector<1x32xf32> to vector<16x32xf32>
    %163 = arith.addf %161, %162 : vector<16x32xf32>
    %164 = arith.addf %116, %163 : vector<16x32xf32>
    %165 = vector.shape_cast %164 : vector<16x32xf32> to vector<2x8x32xf32>
    %c0_51 = arith.constant 0 : index
    %c0_52 = arith.constant 0 : index
    %c0_53 = arith.constant 0 : index
    %166 = vector.load %arg15[%c0_51, %c0_52, %c0_53] : memref<2x8x32xf32, #tpu.memory_space<vmem>>, vector<2x8x32xf32>
    tpu.vector_store %arg15[%c0_51, %c0_52, %c0_53], %165 {strides = array<i32>} : memref<2x8x32xf32, #tpu.memory_space<vmem>>, vector<2x8x32xf32>,
    %c1_i32 = arith.constant 1 : i32
    %167 = arith.cmpi eq, %arg1, %c1_i32 : i32
    %168 = arith.extui %167 : i1 to i32
    %c0_i32_54 = arith.constant 0 : i32
    %169 = arith.cmpi ne, %168, %c0_i32_54 : i32
    scf.if %169 {
      %c0_55 = arith.constant 0 : index
      %c0_56 = arith.constant 0 : index
      %170 = vector.load %arg9[%c0_55, %c0_56] : memref<1x32xf32, #tpu.memory_space<vmem>>, vector<1x32xf32>
      %c0_57 = arith.constant 0 : index
      %c0_58 = arith.constant 0 : index
      %171 = vector.load %arg10[%c0_57, %c0_58] : memref<1x32xf32, #tpu.memory_space<vmem>>, vector<1x32xf32>
      %cst_59 = arith.constant dense<0.000000e+00> : vector<16xf32>
      %172 = vector.multi_reduction <add>, %164, %cst_59 [1] : vector<16x32xf32> to vector<16xf32>
      %173 = vector.shape_cast %172 : vector<16xf32> to vector<16x1xf32>
      %cst_60 = arith.constant 3.200000e+01 : f32
      %174 = vector.broadcast %cst_60 : f32 to vector<16x1xf32>
      %175 = arith.divf %173, %174 : vector<16x1xf32>
      %176 = vector.broadcast %175 : vector<16x1xf32> to vector<16x32xf32>
      %177 = arith.subf %164, %176 : vector<16x32xf32>
      %178 = arith.mulf %177, %177 : vector<16x32xf32>
      %cst_61 = arith.constant dense<0.000000e+00> : vector<16xf32>
      %179 = vector.multi_reduction <add>, %178, %cst_61 [1] : vector<16x32xf32> to vector<16xf32>
      %180 = vector.shape_cast %179 : vector<16xf32> to vector<16x1xf32>
      %cst_62 = arith.constant 3.200000e+01 : f32
      %181 = vector.broadcast %cst_62 : f32 to vector<16x1xf32>
      %182 = arith.divf %180, %181 : vector<16x1xf32>
      %183 = vector.broadcast %175 : vector<16x1xf32> to vector<16x32xf32>
      %184 = arith.subf %164, %183 : vector<16x32xf32>
      %cst_63 = arith.constant 9.99999974E-6 : f32
      %185 = vector.broadcast %cst_63 : f32 to vector<16x1xf32>
      %186 = arith.addf %182, %185 : vector<16x1xf32>
      %187 = math.rsqrt %186 : vector<16x1xf32>
      %188 = vector.broadcast %187 : vector<16x1xf32> to vector<16x32xf32>
      %189 = arith.mulf %184, %188 : vector<16x32xf32>
      %190 = vector.broadcast %170 : vector<1x32xf32> to vector<16x32xf32>
      %191 = arith.mulf %189, %190 : vector<16x32xf32>
      %192 = vector.broadcast %171 : vector<1x32xf32> to vector<16x32xf32>
      %193 = arith.addf %191, %192 : vector<16x32xf32>
      %194 = arith.truncf %193 : vector<16x32xf32> to vector<16x32xbf16>
      %c0_64 = arith.constant 0 : index
      %c0_65 = arith.constant 0 : index
      %195 = vector.load %arg11[%c0_64, %c0_65] : memref<32x16xbf16, #tpu.memory_space<vmem>>, vector<32x16xbf16>
      %cst_66 = arith.constant dense<0.000000e+00> : vector<16x16xf32>
      %196 = tpu.matmul %194, %195, %cst_66 {dimension_numbers = #tpu.dot_dimension_numbers<[1], [0], [0], [1], [0, 0, 1, 1], [], []>} : vector<16x32xbf16>, vector<32x16xbf16>, vector<16x16xf32> -> vector<16x16xf32>
      %c0_67 = arith.constant 0 : index
      %c0_68 = arith.constant 0 : index
      %197 = vector.load %arg12[%c0_67, %c0_68] : memref<1x16xf32, #tpu.memory_space<vmem>>, vector<1x16xf32>
      %198 = vector.broadcast %197 : vector<1x16xf32> to vector<16x16xf32>
      %199 = arith.addf %196, %198 : vector<16x16xf32>
      %200 = vector.shape_cast %199 : vector<16x16xf32> to vector<2x8x16xf32>
      %c0_69 = arith.constant 0 : index
      %c0_70 = arith.constant 0 : index
      %c0_71 = arith.constant 0 : index
      %201 = vector.load %arg13[%c0_69, %c0_70, %c0_71] : memref<2x8x16xf32, #tpu.memory_space<vmem>>, vector<2x8x16xf32>
      tpu.vector_store %arg13[%c0_69, %c0_70, %c0_71], %200 {strides = array<i32>} : memref<2x8x16xf32, #tpu.memory_space<vmem>>, vector<2x8x16xf32>,
    } else {
    }
    return
  }
  func.func @transform_0(%arg0: i32, %arg1: i32) -> (i32, i32, i32) {
    %c0_i32 = arith.constant 0 : i32
    %c0_i32_0 = arith.constant 0 : i32
    %c0_i32_1 = arith.constant 0 : i32
    return %arg0, %c0_i32, %c0_i32_0 : i32, i32, i32
  }
  func.func @transform_1(%arg0: i32, %arg1: i32) -> (i32, i32) {
    %c0_i32 = arith.constant 0 : i32
    %c0_i32_0 = arith.constant 0 : i32
    %c0_i32_1 = arith.constant 0 : i32
    return %c0_i32, %c0_i32_0 : i32, i32
  }
  func.func @transform_2(%arg0: i32, %arg1: i32) -> (i32, i32, i32) {
    %c0_i32 = arith.constant 0 : i32
    %c0_i32_0 = arith.constant 0 : i32
    %c0_i32_1 = arith.constant 0 : i32
    return %arg1, %c0_i32, %c0_i32_0 : i32, i32, i32
  }
  func.func @transform_3(%arg0: i32, %arg1: i32) -> (i32, i32, i32) {
    %c0_i32 = arith.constant 0 : i32
    %c0_i32_0 = arith.constant 0 : i32
    %c0_i32_1 = arith.constant 0 : i32
    return %arg1, %c0_i32, %c0_i32_0 : i32, i32, i32
  }
  func.func @transform_4(%arg0: i32, %arg1: i32) -> (i32, i32, i32) {
    %c0_i32 = arith.constant 0 : i32
    %c0_i32_0 = arith.constant 0 : i32
    %c0_i32_1 = arith.constant 0 : i32
    return %arg1, %c0_i32, %c0_i32_0 : i32, i32, i32
  }
  func.func @transform_5(%arg0: i32, %arg1: i32) -> (i32, i32, i32) {
    %c0_i32 = arith.constant 0 : i32
    %c0_i32_0 = arith.constant 0 : i32
    %c0_i32_1 = arith.constant 0 : i32
    return %arg1, %c0_i32, %c0_i32_0 : i32, i32, i32
  }
  func.func @transform_6(%arg0: i32, %arg1: i32) -> (i32, i32, i32) {
    %c0_i32 = arith.constant 0 : i32
    %c0_i32_0 = arith.constant 0 : i32
    %c0_i32_1 = arith.constant 0 : i32
    return %arg1, %c0_i32, %c0_i32_0 : i32, i32, i32
  }
  func.func @transform_7(%arg0: i32, %arg1: i32) -> (i32, i32) {
    %c0_i32 = arith.constant 0 : i32
    %c0_i32_0 = arith.constant 0 : i32
    %c0_i32_1 = arith.constant 0 : i32
    return %c0_i32, %c0_i32_0 : i32, i32
  }
  func.func @transform_8(%arg0: i32, %arg1: i32) -> (i32, i32) {
    %c0_i32 = arith.constant 0 : i32
    %c0_i32_0 = arith.constant 0 : i32
    %c0_i32_1 = arith.constant 0 : i32
    return %c0_i32, %c0_i32_0 : i32, i32
  }
  func.func @transform_9(%arg0: i32, %arg1: i32) -> (i32, i32) {
    %c0_i32 = arith.constant 0 : i32
    %c0_i32_0 = arith.constant 0 : i32
    %c0_i32_1 = arith.constant 0 : i32
    return %c0_i32, %c0_i32_0 : i32, i32
  }
  func.func @transform_10(%arg0: i32, %arg1: i32) -> (i32, i32) {
    %c0_i32 = arith.constant 0 : i32
    %c0_i32_0 = arith.constant 0 : i32
    %c0_i32_1 = arith.constant 0 : i32
    return %c0_i32, %c0_i32_0 : i32, i32
  }
  func.func @transform_11(%arg0: i32, %arg1: i32) -> (i32, i32, i32) {
    %c0_i32 = arith.constant 0 : i32
    %c0_i32_0 = arith.constant 0 : i32
    %c0_i32_1 = arith.constant 0 : i32
    return %arg0, %c0_i32, %c0_i32_0 : i32, i32, i32
  }
  func.func @transform_12(%arg0: i32, %arg1: i32) -> (i32, i32, i32, i32) {
    %c0_i32 = arith.constant 0 : i32
    %c0_i32_0 = arith.constant 0 : i32
    %c0_i32_1 = arith.constant 0 : i32
    return %arg0, %arg1, %c0_i32, %c0_i32_0 : i32, i32, i32, i32
  }
}

</mosaic_0001>

<bundles_post_ra>
// kernel: tpu_custom_call.1
= control target key start
LH: loop header
LB: loop body
LE: loop exit
PB: predicated region body
PF: predicated region fallthrough
CT: control target
= control target key end

     0   :  { %s2610_s0 = inlined_call_operand.vmem [shape: f32[2,8,32], index: 0, kind: input, shape index: {}]   ;;  %s2611_s1 = inlined_call_operand.vmem [shape: f32[8,8], index: 1, kind: input, shape index: {}]   ;;  %s2612_s2 = inlined_call_operand.vmem [shape: bf16[2,32,96], index: 2, kind: input, shape index: {}]   ;;  %s2613_s3 = inlined_call_operand.vmem [shape: bf16[2,32,32], index: 3, kind: input, shape index: {}]   ;;  %s2614_s4 = inlined_call_operand.vmem [shape: bf16[2,32,64], index: 4, kind: input, shape index: {}]   ;;  %s2615_s5 = inlined_call_operand.vmem [shape: bf16[2,64,32], index: 5, kind: input, shape index: {}]   ;;  %s2616_s6 = inlined_call_operand.vmem [shape: f32[2,10,64], index: 6, kind: input, shape index: {}]   ;;  %s2617_s7 = inlined_call_operand.vmem [shape: f32[1,32], index: 7, kind: input, shape index: {}]   ;;  %s2618_s8 = inlined_call_operand.vmem [shape: f32[1,32], index: 8, kind: input, shape index: {}]   ;;  %s2619_s9 = inlined_call_operand.vmem [shape: bf16[32,16], index: 9, kind: input, shape index: {}]   ;;  %s2620_s10 = inlined_call_operand.vmem [shape: f32[1,16], index: 10, kind: input, shape index: {}]   ;;  %s2621_s11 = inlined_call_operand.hbm [shape: f32[2,8,16], index: 11, kind: output, shape index: {0}]   ;;  %s2622_s12 = inlined_call_operand.hbm [shape: bf16[2,2,8,8], index: 12, kind: output, shape index: {1}]  }
   0x1   :  { %2636 = sst [smem:[#allocation18_spill]] %s2610_s0 }
   0x2   :  { %2637 = sst [smem:[#allocation19_spill]] %s2622_s12 }
   0x3   :  { %18 = vsyncpa [#allocation4], 0 }
   0x4   :  { %19 = vsyncpa [#allocation6], 0 }
   0x5   :  { %21 = vsyncpa [#allocation6 + $0x1], 0  ;;  %s2221_s21 = smov 0   ;;  %s2223_s22 = smov 0  }
   0x6   :  { %s2225_s23 = smov 0   ;;  %s2227_s24 = smov 0  }
   0x7   :  { %s2229_s25 = smov 0   ;;  %s2231_s26 = smov 0  }
   0x8 LB: > { %2638 = sst [smem:[#allocation9_spill]] %s2118_s21  ;;  %s1722_s27 = sadd.s32 4294967295, %s2138_s26   ;;  %s2138_s26 = sphi %s2231_s26, %s27_s26   ;;  %s2134_s25 = sphi %s2229_s25, %s2664_s25   ;;  %s2130_s24 = sphi %s2227_s24, %s2663_s24   ;;  %s2126_s23 = sphi %s2225_s23, %s2662_s23   ;;  %s2122_s22 = sphi %s2223_s22, %s2661_s22   ;;  %s2118_s21 = sphi %s2221_s21, %s2660_s21  }
   0x9   : > { %2639 = sst [smem:[#allocation10_spill]] %s2122_s22  ;;  %s1723_s28 = sadd.s32 4294967294, %s2138_s26  }
   0xa   : > { %2640 = sst [smem:[#allocation11_spill]] %s2126_s23  ;;  %s36_s29 = sadd.s32 1, %s2134_s25 }
   0xb   : > { %2641 = sst [smem:[#allocation12_spill]] %s2134_s25  ;;  %s335_s30 = sadd.s32 1, %s2126_s23 }
   0xc   : > { %2642 = sst [smem:[#allocation13_spill]] %s2138_s26  ;;  %p37_p0 = scmp.ge.s32.totalorder %s36_s29, 2 }
   0xd   : > { %p345_p1 = scmp.ne.s32.totalorder %s2126_s23, %s2122_s22  ;;  %p2257_p2 = scmp.eq.s32.totalorder %s1722_s27, 1 }
   0xe   : > { %p351_p3 = scmp.ne.s32.totalorder %s2122_s22, %s2118_s21  ;;  %s2666_s29 = smov (%p37_p0, %s36_s29), 0 }
   0xf   : > { %2644 = sst [smem:[#allocation14_spill]] %s2666_s29  ;;  %p2267_p4 = por %p2257_p2, %p345_p1 }
  0x10   : > { %p352_p5 = scmp.eq.s32.totalorder %s1723_s28, 1  ;;  %s331_s15 = ssub.s32 %s2134_s25, %s2666_s29 }
  0x11   : > { %s2645_s14 = scalar_select %p2267_p4, 1, 0 }
  0x12   : > { %p1727_p6 = scmp.ge.s32.totalorder %s2138_s26, 1  ;;  %p333_p7 = scmp.eq.s32.totalorder %s331_s15, 0 }
  0x13   : > { %2646 = sst [smem:[#allocation15_spill]] %s2645_s14  ;;  %p2274_p8 = por %p352_p5, %p351_p3 }
  0x14   : > { %p434_p9 = scmp.lt.s32.totalorder %s2138_s26, 3 }
  0x15   : > { %s2647_s16 = scalar_select %p2274_p8, 1, 0 }
  0x16   : > { %s2280_s17 = scalar_select %p333_p7, %s2126_s23, %s335_s30  }
  0x17   : > { %2648 = sst [smem:[#allocation16_spill]] %s2647_s16  ;;  %p435_p10 = pnand %p1727_p6, %p434_p9 }
  0x18   : > { %2649 = sst [smem:[#allocation17_spill]] %s2280_s17  ;;  %s2631_s18 = sand.u32 (!%p435_p10), 1, %s2122_s22  }
  0x19   : > { %438 = sbr.rel (%p435_p10) target bundleno = 3728 (0xe90), region = 64  ;;  %p507_p11 = scmp.lt.s32.totalorder (!%p435_p10), %s2130_s24, 1 }
  0x1a   : > { %s1728_s19 = sshll.u32 (!%p435_p10), %s2631_s18, 3  ;;  %p1739_p12 = scmp.ne.s32.totalorder (!%p435_p10), %s2130_s24, 0 }
  0x1b   : > { %s2312_s15 = scalar_lea.vmem (!%p435_p10), [#allocation5], %s1728_s19 }
  0x20   : > { %s508_s20 = scalar_select %p507_p11, %s2130_s24, 1 }
  0x21   : > { %538 = sbr.rel (%p1739_p12) target bundleno = 41 (0x29), region = 68  ;;  %s2650_s0 = sld [smem:[#allocation18_spill]] (!%p1739_p12)  ;;  %vm541_vm0 = vcmask (!%p1739_p12), 261120  }
  0x22   : > { %s1775_s27 = sshll.u32 %s508_s20, 4  ;;  %s1778_s28 = sshll.u32 %s508_s20, 5 }
  0x23   : > { %s2290_s25 = scalar_lea.vmem %s2612_s2, %s1775_s27  ;;  %s2295_s23 = scalar_lea.vmem %s2613_s3, %s1775_s27 }
  0x24   : > { %s2300_s26 = scalar_lea.vmem %s2614_s4, %s1775_s27  ;;  %s2305_s14 = scalar_lea.vmem %s2615_s5, %s1778_s28 }
  0x25   : > { %s2310_s29 = scalar_lea.vmem %s2616_s6, %s1775_s27 }
  0x27   : > { %v539_v0 = vld [vmem:[%s2650_s0] sm:$0xff] (!%p1739_p12)  ;;  %v540_v1 = vld [vmem:[%s2650_s0 + $0x8] sm:$0xff] (!%p1739_p12) }
  0x28   : > { %542 = vst.msk [vmem:[#allocation2] sm:$0xff] %vm541_vm0, %v539_v0  ;;  %543 = vst.msk [vmem:[#allocation2 + $0x8] sm:$0xff] %vm541_vm0, %v540_v1 }
  0x29 PF: > { %vm548_vm1 = vcmask 261120   ;;  %v1986_v16 = vld [vmem:[%s2290_s25] sm:$0xff]   ;;  %v2140_v17 = vmov 0.0   ;;  %v1987_v18 = vld [vmem:[%s2290_s25 + $0x8] sm:$0xff]   ;;  %vm2141_vm2 = vmmov 0   ;;  %v576_v19 = vlaneseq  ;;  %s2142_s12 = smov 32  }
  0x2a   : > { %1813 = vmatprep.subr.bf16.mxu0 %v2140_v17  ;;  %1821 = vmatprep.subr.bf16.mxu1 %v2140_v17  ;;  %v2347_v22 = vld [vmem:[%s2310_s29] sm:$0xff]  ;;  %s2143_s22 = smov 96   ;;  %vm685_vm3 = vcmask 130048   ;;  %vm781_vm4 = vcmask 64512   ;;  %s2635_s19 = smov 64   ;;  %vm814_vm5 = vcmask 1043456  }
  0x2b   : > { %1814 = vmatpush3.bf16.msra.mxu0 %v1986_v16  ;;  %1817 = vmatprep.mubr.msk.bf16.mxu0 %vm2141_vm2, %v2140_v17  ;;  %v2342_v20 = vshrl.u32 %v576_v19, 7  ;;  %v2379_v62 = vld [vmem:[%s2611_s1] sm:$0xff]  ;;  %s2145_s27 = smov 80   ;;  %s2146_s28 = smov 112   ;;  %vm1135_vm6 = vcmask 60416   ;;  %vm1373_vm7 = vcmask 523264  }
  0x2c   : > { %1815 = vmatprep.subr.bf16.mxu0 %v2140_v17  ;;  %1823 = vmatprep.mubr.msk.bf16.mxu1 %vm2141_vm2, %v2140_v17  ;;  %s2147_s20 = smov 48   ;;  %s2148_s17 = smov 16  }
  0x2d   : > { %v657_v21 = vsub.s32 1, %v2342_v20  ;;  %v578_v30 = vsub.s32 4, %v2342_v20  ;;  %v584_v34 = vsub.s32 5, %v2342_v20  ;;  %v651_v52 = vsub.s32 0, %v2342_v20  ;;  %p1762_p13 = scmp.ne.s32.totalorder %s2130_s24, 1 }
  0x2e   : > { %vm2150_vm8 = vmmov (!%p1762_p13), 0  }
  0x2f   : > { %v2321_v2 = vld [vmem:[#allocation2] sm:$0xff]  ;;  %v2323_v3 = vld [vmem:[#allocation2 + $0x8] sm:$0xff]  ;;  %1816 = vmatpush3.bf16.msra.mxu0 %v1987_v18  ;;  %v658_v23 = vrot.slane %v2347_v22, %v657_v21  ;;  %v579_v33 = vrot.slane %v2347_v22, %v578_v30  ;;  %v585_v38 = vrot.slane %v2347_v22, %v584_v34  ;;  %v652_v53 = vrot.slane %v2347_v22, %v651_v52 }
  0x30   : > { %v549_v4 = vsel %vm548_vm1, %v2321_v2, 0.0  ;;  %v552_v5 = vsel %vm548_vm1, %v2323_v3, 0.0  ;;  %1827 = vmatprep.subr.bf16.mxu0 %v2140_v17 }
  0x31   : > { %550 = vadd.xlane.f32.xlu0 %v549_v4 }
  0x35   : > { %553 = vadd.xlane.f32.xlu0 %v552_v5 }
  0x4b   : > { %660 = vrot.lane.b32.xlu0 %v658_v23, %s2142_s12 }
  0xbe   : > { %v551_v6 = vpop.xlane.xlu0 %550 }
  0xbf   : > { %v556_v7 = vmul.f32 0.03125, %v551_v6 }
  0xc1   : > { %v558_v8 = vsub.f32 %v2321_v2, %v556_v7 }
  0xc2   : > { %v554_v9 = vpop.xlane.xlu0 %553 }
  0xc3   : > { %v557_v10 = vmul.f32 0.03125, %v554_v9  ;;  %v560_v11 = vmul.f32 %v558_v8, %v558_v8 }
  0xc5   : > { %v559_v12 = vsub.f32 %v2323_v3, %v557_v10  ;;  %v562_v13 = vsel %vm548_vm1, %v560_v11, 0.0 }
  0xc6   : > { %563 = vadd.xlane.f32.xlu1 %v562_v13  ;;  %v661_v43 = vpop.permute.xlu0 %660  ;;  %v667_v13 = vsub.s32 2, %v2342_v20 }
  0xc7   : > { %v561_v14 = vmul.f32 %v559_v12, %v559_v12 }
  0xc9   : > { %v565_v15 = vsel %vm548_vm1, %v561_v14, 0.0  ;;  %v668_v14 = vrot.slane %v2347_v22, %v667_v13 }
  0xca   : > { %566 = vadd.xlane.f32.xlu1 %v565_v15 }
 0x153   : > { %v564_v24 = vpop.xlane.xlu1 %563 }
 0x154   : > { %v568_v25 = vmul.f32 0.03125, %v564_v24 }
 0x156   : > { %v570_v26 = vadd.f32 1e-05, %v568_v25 }
 0x157   : > { %v567_v27 = vpop.xlane.xlu1 %566 }
 0x158   : > { %1996 = vrsqrt.f32 %v570_v26  ;;  %v569_v28 = vmul.f32 0.03125, %v567_v27 }
 0x15a   : > { %v571_v29 = vadd.f32 1e-05, %v569_v28 }
 0x15c   : > { %1998 = vrsqrt.f32 %v571_v29 }
 0x162   : > { %v1997_v31 = vpop.eup %1996 }
 0x163   : > { %v574_v32 = vmul.f32 %v1997_v31, %v558_v8 }
 0x165   : > { %v580_v37 = vmul.f32 %v579_v33, %v574_v32 }
 0x166   : > { %v1999_v35 = vpop.eup %1998 }
 0x167   : > { %v575_v36 = vmul.f32 %v1999_v35, %v559_v12  ;;  %v586_v40 = vadd.f32 %v585_v38, %v580_v37 }
 0x169   : > { %v581_v39 = vmul.f32 %v579_v33, %v575_v36 }
 0x16b   : > { %v587_v41 = vadd.f32 %v585_v38, %v581_v39 }
 0x16d   : > { %v588_v42 = vpack.c.bf16 %v587_v41, %v586_v40 }
 0x16f   : > { %1818 = vmatmul.mubr.msk.bf16.vlgmr.msra.gmra.mrb[0].mxu0 %vm548_vm1, %v588_v42 }
 0x170   : > { %1829 = vmatprep.mubr.msk.bf16.mxu0 %vm2141_vm2, %v2140_v17 }
 0x242   : > { %v642_v44 = vpop.f32.mrb[0].mxu0 }
 0x243   : > { %v663_v45 = vadd.f32 %v661_v43, %v642_v44  ;;  %v1819_v46 = vpop.f32.mrb[1].mxu0  ;;  %v653_v56 = vadd.f32 %v652_v53, %v642_v44 }
 0x244   : > { %v645_v47 = vpop.f32.mrb[2].mxu0 }
 0x245   : > { %v678_v48 = vpack.c.bf16 %v663_v45, %v663_v45  ;;  %v664_v49 = vadd.f32 %v661_v43, %v645_v47  ;;  %v1820_v50 = vpop.f32.mrb[3].mxu0  ;;  %v676_v59 = vpack.c.bf16 %v653_v56, %v653_v56  ;;  %v654_v60 = vadd.f32 %v652_v53, %v645_v47 }
 0x247   : > { %683 = vrot.lane.b32.xlu1 %v678_v48, %s2143_s22  ;;  %v2359_v51 = vpack.c.bf16 %v664_v49, %v664_v49  ;;  %v677_v61 = vpack.c.bf16 %v654_v60, %v654_v60 }
 0x24b   : > { %733 = vrot.lane.b32.xlu1 %v2359_v51, %s2143_s22 }
 0x2b9   : > { %v684_v54 = vpop.permute.xlu1 %683 }
 0x2ba   : > { %v690_v55 = vsel %vm685_vm3, %v684_v54, 0 }
 0x2bb   : > { %1822 = vmatpush3.bf16.xpose.msra.mxu1 %v690_v55 }
 0x2bc   : > { %1833 = vmatprep.subr.bf16.mxu1 %v2140_v17 }
 0x2bd   : > { %v734_v57 = vpop.permute.xlu1 %733 }
 0x2be   : > { %v739_v58 = vsel %vm685_vm3, %v734_v57, 0 }
 0x2bf   : > { %1828 = vmatpush3.bf16.xpose.msra.mxu0 %v739_v58 }
 0x2c0   : > { %1839 = vmatprep.subr.bf16.mxu0 %v2140_v17 }
 0x2c2   : > { %1824 = vmatmul.mubr.msk.bf16.vlgmr.msra.gmra.mrb[0].mxu1 %vm685_vm3, %v676_v59 }
 0x2c3   : > { %1835 = vmatprep.mubr.msk.bf16.mxu1 %vm2141_vm2, %v2140_v17 }
 0x2c6   : > { %1830 = vmatmul.mubr.msk.bf16.vlgmr.msra.gmra.mrb[4].mxu0 %vm685_vm3, %v677_v61 }
 0x2c7   : > { %1841 = vmatprep.mubr.msk.bf16.mxu0 %vm2141_vm2, %v2140_v17 }
 0x395   : > { %v726_v63 = vpop.f32.mrb[0].mxu1 }
 0x396   : > { %v727_v0 = vadd.f32 %v726_v63, %v2379_v62  ;;  %v1825_v1 = vpop.f32.mrb[1].mxu1 }
 0x397   : > { %v729_v4 = vpop.f32.mrb[2].mxu1 }
 0x398   : > { %v1826_v5 = vpop.f32.mrb[3].mxu1  ;;  %v782_v6 = vsel %vm781_vm4, %v727_v0, -inf }
 0x399   : > { %783 = vmax.xlane.f32.xlu1 %v782_v6  ;;  %v775_v7 = vpop.f32.mrb[4].mxu0 }
 0x39a   : > { %v776_v8 = vadd.f32 %v775_v7, %v2379_v62  ;;  %v1831_v9 = vpop.f32.mrb[5].mxu0 }
 0x39b   : > { %v778_v10 = vpop.f32.mrb[6].mxu0 }
 0x39c   : > { %v1832_v11 = vpop.f32.mrb[7].mxu0  ;;  %v785_v12 = vsel %vm781_vm4, %v776_v8, -inf }
 0x39d   : > { %786 = vmax.xlane.f32.xlu0 %v785_v12 }
 0x3b3   : > { %670 = vrot.lane.b32.xlu0 %v668_v14, %s2635_s19 }
 0x426   : > { %v784_v25 = vpop.xlane.xlu1 %783 }
 0x427   : > { %v788_v26 = vsub.f32 %v727_v0, %v784_v25 }
 0x429   : > { %v790_v27 = vmul.f32 1.442695, %v788_v26 }
 0x42a   : > { %v787_v15 = vpop.xlane.xlu0 %786 }
 0x42b   : > { %v789_v28 = vsub.f32 %v776_v8, %v787_v15  ;;  %2000 = vpow2.f32 %v790_v27 }
 0x42d   : > { %v792_v29 = vmul.f32 1.442695, %v789_v28 }
 0x42e   : > { %v671_v16 = vpop.permute.xlu0 %670 }
 0x42f   : > { %v673_v18 = vadd.f32 %v671_v16, %v642_v44  ;;  %v674_v19 = vadd.f32 %v671_v16, %v645_v47  ;;  %2002 = vpow2.f32 %v792_v29 }
 0x431   : > { %v2388_v23 = vpack.c.bf16 %v673_v18, %v673_v18  ;;  %v2390_v24 = vpack.c.bf16 %v674_v19, %v674_v19 }
 0x433   : > { %859 = vrot.lane.b32.xlu0 %v2390_v24, %s2635_s19  ;;  %809 = vrot.lane.b32.xlu1 %v2388_v23, %s2635_s19 }
 0x435   : > { %v2001_v30 = vpop.eup %2000 }
 0x436   : > { %v794_v31 = vsel %vm781_vm4, %v2001_v30, 0.0 }
 0x437   : > { %910 = vrot.lane.b32.xlu0 %v678_v48, %s2145_s27 }
 0x439   : > { %v2003_v32 = vpop.eup %2002 }
 0x43a   : > { %v797_v33 = vsel %vm781_vm4, %v2003_v32, 0.0 }
 0x43b   : > { %908 = vrot.lane.b32.xlu0 %v676_v59, %s2146_s28 }
 0x457   : > { %795 = vadd.xlane.f32.xlu1 %v794_v31 }
 0x45b   : > { %798 = vadd.xlane.f32.xlu1 %v797_v33 }
 0x46c   : > { %961 = vrot.lane.b32.xlu1 %v2359_v51, %s2145_s27 }
 0x470   : > { %959 = vrot.lane.b32.xlu1 %v677_v61, %s2146_s28 }
 0x4a5   : > { %v860_v34 = vpop.permute.xlu0 %859  ;;  %v810_v35 = vpop.permute.xlu1 %809 }
 0x4a6   : > { %v865_v36 = vsel %vm814_vm5, %v860_v34, 0  ;;  %v816_v37 = vsel %vm814_vm5, %v810_v35, 0 }
 0x4a7   : > { %1834 = vmatpush3.bf16.msra.mxu1 %v816_v37  ;;  %1840 = vmatpush3.bf16.msra.mxu0 %v865_v36 }
 0x4a8   : > { %1845 = vmatprep.subr.bf16.mxu1 %v2140_v17  ;;  %1851 = vmatprep.subr.bf16.mxu0 %v2140_v17 }
 0x4a9   : > { %v911_v42 = vpop.permute.xlu0 %910 }
 0x4aa   : > { %v916_v45 = vsel %vm685_vm3, %v911_v42, 0 }
 0x4ad   : > { %v909_v50 = vpop.permute.xlu0 %908 }
 0x4e4   : > { %v796_v38 = vpop.xlane.xlu1 %795 }
 0x4e5   : > { %2004 = vrcp.f32 %v796_v38 }
 0x4e8   : > { %v799_v39 = vpop.xlane.xlu1 %798 }
 0x4e9   : > { %2006 = vrcp.f32 %v799_v39 }
 0x4ec   : > { %v962_v47 = vpop.permute.xlu1 %961 }
 0x4ed   : > { %v967_v49 = vsel %vm685_vm3, %v962_v47, 0 }
 0x4ef   : > { %v2005_v40 = vpop.eup %2004 }
 0x4f0   : > { %v2403_v41 = vmul.f32 %v2005_v40, %v2001_v30  ;;  %v960_v51 = vpop.permute.xlu1 %959 }
 0x4f2   : > { %v806_v43 = vpack.c.bf16 %v2403_v41, %v2403_v41 }
 0x4f3   : > { %v2007_v44 = vpop.eup %2006 }
 0x4f4   : > { %v2408_v46 = vmul.f32 %v2007_v44, %v2003_v32  ;;  %1836 = vmatmul.mubr.msk.bf16.vlgmr.msra.gmra.mrb[4].mxu1 %vm781_vm4, %v806_v43  ;;  %v1988_v43 = vld [vmem:[%s2295_s23] sm:$0xff]   ;;  %v1989_v44 = vld [vmem:[%s2295_s23 + $0x8] sm:$0xff]  }
 0x4f5   : > { %1846 = vmatpush3.bf16.xpose.msra.mxu1 %v916_v45  ;;  %1847 = vmatprep.mubr.msk.bf16.mxu1 %vm2141_vm2, %v2140_v17 }
 0x4f6   : > { %v807_v48 = vpack.c.bf16 %v2408_v46, %v2408_v46  ;;  %1857 = vmatprep.subr.bf16.mxu1 %v2140_v17 }
 0x4f8   : > { %1842 = vmatmul.mubr.msk.bf16.vlgmr.msra.gmra.mrb[8].mxu0 %vm781_vm4, %v807_v48 }
 0x4f9   : > { %1852 = vmatpush3.bf16.xpose.msra.mxu0 %v967_v49  ;;  %1853 = vmatprep.mubr.msk.bf16.mxu0 %vm2141_vm2, %v2140_v17 }
 0x4fa   : > { %1863 = vmatprep.subr.bf16.mxu0 %v2140_v17 }
 0x4fc   : > { %1848 = vmatmul.mubr.msk.bf16.vlgmr.msra.gmra.mrb[8].mxu1 %vm685_vm3, %v909_v50 }
 0x4fd   : > { %1859 = vmatprep.mubr.msk.bf16.mxu1 %vm2141_vm2, %v2140_v17 }
 0x500   : > { %1854 = vmatmul.mubr.msk.bf16.vlgmr.msra.gmra.mrb[12].mxu0 %vm685_vm3, %v960_v51 }
 0x501   : > { %1865 = vmatprep.mubr.msk.bf16.mxu0 %vm2141_vm2, %v2140_v17 }
 0x5c7   : > { %v2427_v53 = vpop.f32.mrb[4].mxu1 }
 0x5c8   : > { %v1837_v54 = vpop.f32.mrb[5].mxu1 }
 0x5c9   : > { %v855_v55 = vpop.f32.mrb[6].mxu1 }
 0x5ca   : > { %v1838_v56 = vpop.f32.mrb[7].mxu1 }
 0x5cb   : > { %v2429_v57 = vpop.f32.mrb[8].mxu0 }
 0x5cc   : > { %v1843_v58 = vpop.f32.mrb[9].mxu0 }
 0x5cd   : > { %v904_v59 = vpop.f32.mrb[10].mxu0 }
 0x5ce   : > { %v1844_v60 = vpop.f32.mrb[11].mxu0 }
 0x5cf   : > { %v952_v61 = vpop.f32.mrb[8].mxu1 }
 0x5d0   : > { %v953_v63 = vadd.f32 %v952_v61, %v2379_v62  ;;  %v1849_v0 = vpop.f32.mrb[9].mxu1 }
 0x5d1   : > { %v955_v1 = vpop.f32.mrb[10].mxu1  ;;  %v1155_v0 = vsub.s32 3, %v2342_v20 }
 0x5d2   : > { %v1850_v4 = vpop.f32.mrb[11].mxu1  ;;  %v1009_v5 = vsel %vm781_vm4, %v953_v63, -inf }
 0x5d3   : > { %1010 = vmax.xlane.f32.xlu0 %v1009_v5  ;;  %v1003_v6 = vpop.f32.mrb[12].mxu0  ;;  %v1156_v1 = vrot.slane %v2347_v22, %v1155_v0 }
 0x5d4   : > { %v1004_v7 = vadd.f32 %v1003_v6, %v2379_v62  ;;  %v1855_v8 = vpop.f32.mrb[13].mxu0 }
 0x5d5   : > { %v1006_v9 = vpop.f32.mrb[14].mxu0 }
 0x5d6   : > { %v1856_v10 = vpop.f32.mrb[15].mxu0  ;;  %v1012_v11 = vsel %vm781_vm4, %v1004_v7, -inf }
 0x5d7   : > { %1013 = vmax.xlane.f32.xlu1 %v1012_v11 }
 0x5e8   : > { %1083 = vrot.lane.b32.xlu1 %v2390_v24, %s2147_s20 }
 0x660   : > { %v1011_v12 = vpop.xlane.xlu0 %1010 }
 0x661   : > { %v1015_v13 = vsub.f32 %v953_v63, %v1011_v12 }
 0x663   : > { %v1017_v14 = vmul.f32 1.442695, %v1015_v13 }
 0x664   : > { %v1014_v15 = vpop.xlane.xlu1 %1013 }
 0x665   : > { %2008 = vpow2.f32 %v1017_v14  ;;  %v1016_v16 = vsub.f32 %v1004_v7, %v1014_v15 }
 0x667   : > { %v1019_v18 = vmul.f32 1.442695, %v1016_v16 }
 0x668   : > { %v1084_v19 = vpop.permute.xlu1 %1083 }
 0x669   : > { %2010 = vpow2.f32 %v1019_v18  ;;  %v1089_v62 = vsel %vm814_vm5, %v1084_v19, 0 }
 0x66a   : > { %1864 = vmatpush3.bf16.msra.mxu0 %v1089_v62 }
 0x66b   : > { %1877 = vmatprep.subr.bf16.mxu0 %v2140_v17 }
 0x66f   : > { %v2009_v25 = vpop.eup %2008 }
 0x670   : > { %v1021_v26 = vsel %vm781_vm4, %v2009_v25, 0.0 }
 0x671   : > { %1022 = vadd.xlane.f32.xlu0 %v1021_v26  ;;  %v1991_v26 = vld [vmem:[%s2300_s26 + $0x8] sm:$0xff]  }
 0x673   : > { %v2011_v27 = vpop.eup %2010 }
 0x674   : > { %v1024_v24 = vsel %vm781_vm4, %v2011_v27, 0.0 }
 0x675   : > { %1025 = vadd.xlane.f32.xlu0 %v1024_v24 }
 0x68b   : > { %1035 = vrot.lane.b32.xlu0 %v2388_v23, %s2147_s20 }
 0x6fe   : > { %v1023_v28 = vpop.xlane.xlu0 %1022 }
 0x6ff   : > { %2012 = vrcp.f32 %v1023_v28 }
 0x702   : > { %v1026_v29 = vpop.xlane.xlu0 %1025 }
 0x703   : > { %2014 = vrcp.f32 %v1026_v29 }
 0x706   : > { %v1036_v30 = vpop.permute.xlu0 %1035 }
 0x707   : > { %v1041_v31 = vsel %vm814_vm5, %v1036_v30, 0 }
 0x708   : > { %1858 = vmatpush3.bf16.msra.mxu1 %v1041_v31 }
 0x709   : > { %v2013_v32 = vpop.eup %2012  ;;  %1869 = vmatprep.subr.bf16.mxu1 %v2140_v17 }
 0x70a   : > { %v1029_v33 = vmul.f32 %v2013_v32, %v2009_v25  ;;  %v1990_v25 = vld [vmem:[%s2300_s26] sm:$0xff]   ;;  %v1243_v32 = vsub.s32 6, %v2342_v20 }
 0x70c   : > { %v1031_v34 = vadd.f32 %v1029_v33, %v2403_v41  ;;  %v1033_v35 = vpack.c.bf16 %v1029_v33, %v1029_v33 }
 0x70d   : > { %v2015_v36 = vpop.eup %2014 }
 0x70e   : > { %v1131_v23 = vmul.f32 0.5, %v1031_v34  ;;  %v1030_v37 = vmul.f32 %v2015_v36, %v2011_v27  ;;  %1860 = vmatmul.mubr.msk.bf16.vlgmr.msra.gmra.mrb[12].mxu1 %vm781_vm4, %v1033_v35  ;;  %v1244_v34 = vrot.slane %v2347_v22, %v1243_v32  ;;  %v1249_v36 = vsub.s32 7, %v2342_v20 }
 0x70f   : > { %1873 = vmatprep.mubr.msk.bf16.mxu1 %vm2141_vm2, %v2140_v17  ;;  %1870 = vmatpush3.bf16.msra.mxu1 %v1988_v43 }
 0x710   : > { %v1133_v38 = vpack.c.bf16 %v1131_v23, %v1131_v23  ;;  %v1032_v39 = vadd.f32 %v1030_v37, %v2408_v46  ;;  %v1034_v40 = vpack.c.bf16 %v1030_v37, %v1030_v37  ;;  %1871 = vmatprep.subr.bf16.mxu1 %v2140_v17 }
 0x712   : > { %1136 = vst.msk [vmem:[%s2312_s15] sm:$0xf] %vm1135_vm6, %v1133_v38  ;;  %v1132_v42 = vmul.f32 0.5, %v1032_v39  ;;  %1866 = vmatmul.mubr.msk.bf16.vlgmr.msra.gmra.mrb[16].mxu0 %vm781_vm4, %v1034_v40  ;;  %v1250_v39 = vrot.slane %v2347_v22, %v1249_v36  ;;  %v1995_v22 = vld [vmem:[%s2305_s14 + $0x18] sm:$0xff]  }
 0x713   : > { %1881 = vmatprep.mubr.msk.bf16.mxu0 %vm2141_vm2, %v2140_v17  ;;  %1872 = vmatpush3.bf16.msra.mxu1 %v1989_v44  ;;  %v1992_v44 = vld [vmem:[%s2305_s14] sm:$0xff]  }
 0x714   : > { %v1134_v41 = vpack.c.bf16 %v1132_v42, %v1132_v42  ;;  %1885 = vmatprep.subr.bf16.mxu1 %v2140_v17  ;;  %1878 = vmatpush3.bf16.msra.mxu0 %v1990_v25 }
 0x715   : > { %1879 = vmatprep.subr.bf16.mxu0 %v2140_v17 }
 0x716   : > { %1137 = vst.msk [vmem:[%s2312_s15 + $0x4] sm:$0xf] %vm1135_vm6, %v1134_v41 }
 0x718   : > { %1880 = vmatpush3.bf16.msra.mxu0 %v1991_v26 }
 0x7e1   : > { %v1077_v45 = vpop.f32.mrb[12].mxu1 }
 0x7e2   : > { %v1861_v46 = vpop.f32.mrb[13].mxu1 }
 0x7e3   : > { %v1080_v47 = vpop.f32.mrb[14].mxu1  ;;  %v1994_v46 = vld [vmem:[%s2305_s14 + $0x10] sm:$0xff]  }
 0x7e4   : > { %v1862_v48 = vpop.f32.mrb[15].mxu1  ;;  %v547_v47 = vld [vmem:[%s2310_s29 + $0x8] sm:$0x3] }
 0x7e5   : > { %v1125_v49 = vpop.f32.mrb[16].mxu0  ;;  %v1261_v48 = vrot.slane %v547_v47, %v657_v21 }
 0x7e6   : > { %v1981_v50 = vpack.i.bf16 %v1125_v49, %v1077_v45  ;;  %v1867_v51 = vpop.f32.mrb[17].mxu0  ;;  %v1993_v45 = vld [vmem:[%s2305_s14 + $0x8] sm:$0xff]  }
 0x7e7   : > { %v1128_v54 = vpop.f32.mrb[18].mxu0 }
 0x7e8   : > { %1982 = vrot.lane.b32.xlu1 %v1981_v50, %s2148_s17  ;;  %v1868_v55 = vpop.f32.mrb[19].mxu0 }
 0x85a   : > { %v1983_v56 = vpop.permute.xlu1 %1982 }
 0x85b   : > { %v1985_v58 = vunpack.i.h.bf16 %v1983_v56  ;;  %v1984_v59 = vunpack.i.l.bf16 %v1983_v56 }
 0x85d   : > { %v1147_v60 = vsel %vm685_vm3, %v2429_v57, %v1985_v58  ;;  %v1146_v61 = vsel %vm685_vm3, %v2427_v53, %v1984_v59 }
 0x85e   : > { %v1148_v63 = vpack.c.bf16 %v1147_v60, %v1146_v61 }
 0x860   : > { %1874 = vmatmul.mubr.msk.bf16.vlgmr.msra.gmra.mrb[16].mxu1 %vm548_vm1, %v1148_v63 }
 0x861   : > { %1893 = vmatprep.mubr.msk.bf16.mxu1 %vm2141_vm2, %v2140_v17  ;;  %1886 = vmatpush3.bf16.msra.mxu1 %v1992_v44 }
 0x862   : > { %1887 = vmatprep.subr.bf16.mxu1 %v2140_v17 }
 0x865   : > { %1888 = vmatpush3.bf16.msra.mxu1 %v1993_v45 }
 0x866   : > { %1889 = vmatprep.subr.bf16.mxu1 %v2140_v17 }
 0x869   : > { %1890 = vmatpush3.bf16.msra.mxu1 %v1994_v46 }
 0x86a   : > { %1891 = vmatprep.subr.bf16.mxu1 %v2140_v17 }
 0x86d   : > { %1892 = vmatpush3.bf16.msra.mxu1 %v1995_v22  ;;  %v1764_v22 = vld [vmem:[%s2618_s8] ss:$0 sm:$0xff] (!%p1762_p13) }
 0x933   : > { %v1206_v4 = vpop.f32.mrb[16].mxu1 }
 0x934   : > { %v1207_v5 = vadd.f32 %v1206_v4, %v1156_v1  ;;  %v1875_v6 = vpop.f32.mrb[17].mxu1 }
 0x935   : > { %v1209_v7 = vpop.f32.mrb[18].mxu1 }
 0x936   : > { %v2467_v8 = vadd.f32 %v1207_v5, %v2321_v2  ;;  %v1210_v57 = vadd.f32 %v1209_v7, %v1156_v1  ;;  %v1876_v9 = vpop.f32.mrb[19].mxu1 }
 0x938   : > { %v2470_v53 = vadd.f32 %v1210_v57, %v2323_v3  ;;  %v1215_v10 = vsel %vm548_vm1, %v2467_v8, 0.0 }
 0x939   : > { %1216 = vadd.xlane.f32.xlu1 %v1215_v10 }
 0x93a   : > { %v1218_v11 = vsel %vm548_vm1, %v2470_v53, 0.0 }
 0x93b   : > { %1219 = vadd.xlane.f32.xlu0 %v1218_v11 }
 0x9c6   : > { %v1217_v12 = vpop.xlane.xlu1 %1216 }
 0x9c7   : > { %v1221_v13 = vmul.f32 0.03125, %v1217_v12 }
 0x9c8   : > { %v1220_v14 = vpop.xlane.xlu0 %1219 }
 0x9c9   : > { %v1223_v2 = vsub.f32 %v2467_v8, %v1221_v13  ;;  %v1222_v15 = vmul.f32 0.03125, %v1220_v14  ;;  %v1348_v14 = vrot.slane %v547_v47, %v651_v52 }
 0x9cb   : > { %v1224_v16 = vsub.f32 %v2470_v53, %v1222_v15  ;;  %v1225_v3 = vmul.f32 %v1223_v2, %v1223_v2 }
 0x9cd   : > { %v1227_v18 = vsel %vm548_vm1, %v1225_v3, 0.0  ;;  %v1226_v19 = vmul.f32 %v1224_v16, %v1224_v16 }
 0x9ce   : > { %1228 = vadd.xlane.f32.xlu0 %v1227_v18 }
 0x9cf   : > { %v1230_v62 = vsel %vm548_vm1, %v1226_v19, 0.0 }
 0x9d2   : > { %1231 = vadd.xlane.f32.xlu0 %v1230_v62 }
 0xa5b   : > { %v1229_v27 = vpop.xlane.xlu0 %1228 }
 0xa5c   : > { %v1233_v24 = vmul.f32 0.03125, %v1229_v27 }
 0xa5e   : > { %v1235_v28 = vadd.f32 1e-05, %v1233_v24 }
 0xa5f   : > { %v1232_v29 = vpop.xlane.xlu0 %1231 }
 0xa60   : > { %2016 = vrsqrt.f32 %v1235_v28  ;;  %v1234_v30 = vmul.f32 0.03125, %v1232_v29 }
 0xa62   : > { %v1236_v31 = vadd.f32 1e-05, %v1234_v30 }
 0xa64   : > { %2018 = vrsqrt.f32 %v1236_v31 }
 0xa6a   : > { %v2017_v33 = vpop.eup %2016 }
 0xa6b   : > { %v1239_v35 = vmul.f32 %v2017_v33, %v1223_v2  ;;  %v2024_v33 = vld [vmem:[%s2619_s9] sm:$0xff] (!%p1762_p13)  }
 0xa6d   : > { %v1245_v37 = vmul.f32 %v1244_v34, %v1239_v35  ;;  %v2025_v35 = vld [vmem:[%s2619_s9 + $0x8] sm:$0xff] (!%p1762_p13)  }
 0xa6e   : > { %v2019_v23 = vpop.eup %2018 }
 0xa6f   : > { %v1240_v38 = vmul.f32 %v2019_v23, %v1224_v16  ;;  %v1251_v42 = vadd.f32 %v1250_v39, %v1245_v37 }
 0xa71   : > { %v1246_v40 = vmul.f32 %v1244_v34, %v1240_v38  ;;  %v2149_v34 = vmov (!%p1762_p13), 0.0  }
 0xa72   : > { %1897 = vmatprep.subr.bf16.mxu0 (!%p1762_p13), %v2149_v34 }
 0xa73   : > { %v1252_v41 = vadd.f32 %v1250_v39, %v1246_v40 }
 0xa75   : > { %v1253_v43 = vpack.c.bf16 %v1252_v41, %v1251_v42 }
 0xa77   : > { %1882 = vmatmul.mubr.msk.bf16.vlgmr.msra.gmra.mrb[20].mxu0 %vm548_vm1, %v1253_v43  ;;  %v1763_v43 = vld [vmem:[%s2617_s7] ss:$0 sm:$0xff] (!%p1762_p13) }
 0xa78   : > { %1901 = vmatprep.mubr.msk.bf16.mxu0 (!%p1762_p13), %vm2150_vm8, %v2149_v34  ;;  %1898 = vmatpush3.bf16.msra.mxu0 (!%p1762_p13), %v2024_v33 }
 0xa79   : > { %1899 = vmatprep.subr.bf16.mxu0 (!%p1762_p13), %v2149_v34 }
 0xa7c   : > { %1900 = vmatpush3.bf16.msra.mxu0 (!%p1762_p13), %v2025_v35 }
 0xb4a   : > { %v1311_v49 = vpop.f32.mrb[20].mxu0 }
 0xb4b   : > { %v1312_v50 = vadd.f32 %v1311_v49, %v1261_v48  ;;  %v1883_v51 = vpop.f32.mrb[21].mxu0 }
 0xb4c   : > { %v1314_v54 = vpop.f32.mrb[22].mxu0  ;;  %v1765_v51 = vld [vmem:[%s2620_s10] ss:$0 sm:$0xff] (!%p1762_p13) }
 0xb4d   : > { %v1318_v55 = vmul.f32 %v1312_v50, %v1312_v50  ;;  %v1315_v56 = vadd.f32 %v1314_v54, %v1261_v48  ;;  %v1884_v58 = vpop.f32.mrb[23].mxu0 }
 0xb4f   : > { %v1320_v59 = vmul.f32 %v1318_v55, %v1312_v50  ;;  %v1319_v60 = vmul.f32 %v1315_v56, %v1315_v56 }
 0xb51   : > { %v1322_v61 = vmul.f32 0.044715, %v1320_v59  ;;  %v1321_v63 = vmul.f32 %v1319_v60, %v1315_v56 }
 0xb53   : > { %v1324_v0 = vadd.f32 %v1322_v61, %v1312_v50  ;;  %v1323_v1 = vmul.f32 0.044715, %v1321_v63 }
 0xb55   : > { %v1326_v17 = vmul.f32 0.7978846, %v1324_v0  ;;  %v1325_v4 = vadd.f32 %v1323_v1, %v1315_v56 }
 0xb57   : > { %2020 = vtanh.f32 %v1326_v17  ;;  %v1327_v5 = vmul.f32 0.7978846, %v1325_v4 }
 0xb59   : > { %2022 = vtanh.f32 %v1327_v5 }
 0xb61   : > { %v2021_v6 = vpop.eup %2020 }
 0xb62   : > { %v1330_v21 = vadd.f32 1.0, %v2021_v6 }
 0xb63   : > { %v2023_v7 = vpop.eup %2022 }
 0xb64   : > { %v1332_v57 = vmul.f32 0.5, %v1330_v21  ;;  %v1331_v9 = vadd.f32 1.0, %v2023_v7 }
 0xb66   : > { %v1333_v10 = vmul.f32 0.5, %v1331_v9  ;;  %v1334_v11 = vmul.f32 %v1332_v57, %v1312_v50 }
 0xb68   : > { %v1335_v12 = vmul.f32 %v1333_v10, %v1315_v56 }
 0xb6a   : > { %v1336_v13 = vpack.c.bf16 %v1335_v12, %v1334_v11 }
 0xb6c   : > { %1894 = vmatmul.mubr.msk.bf16.vlgmr.msra.gmra.mrb[20].mxu1 %vm1373_vm7, %v1336_v13 }
 0xc3f   : > { %v1411_v2 = vpop.f32.mrb[20].mxu1 }
 0xc40   : > { %v1412_v15 = vadd.f32 %v1411_v2, %v1348_v14  ;;  %v1895_v16 = vpop.f32.mrb[21].mxu1  ;;  %1425 = sbr.rel (%p1762_p13) target bundleno = 3676 (0xe5c), region = 72 }
 0xc41   : > { %v1414_v3 = vpop.f32.mrb[22].mxu1 }
 0xc42   : > { %v1418_v18 = vadd.f32 %v1412_v15, %v2467_v8  ;;  %v1415_v19 = vadd.f32 %v1414_v3, %v1348_v14  ;;  %v1896_v62 = vpop.f32.mrb[23].mxu1 }
 0xc44   : > { %1420 = vst.msk [vmem:[#allocation2] sm:$0xff] %vm548_vm1, %v1418_v18  ;;  %v1419_v25 = vadd.f32 %v1415_v19, %v2470_v53  ;;  %v1428_v20 = vsel (!%p1762_p13), %vm548_vm1, %v1418_v18, 0.0 }
 0xc45   : > { %1429 = vadd.xlane.f32.xlu0 (!%p1762_p13), %v1428_v20 }
 0xc46   : > { %1421 = vst.msk [vmem:[#allocation2 + $0x8] sm:$0xff] %vm548_vm1, %v1419_v25  ;;  %v1431_v52 = vsel (!%p1762_p13), %vm548_vm1, %v1419_v25, 0.0 }
 0xc49   : > { %1432 = vadd.xlane.f32.xlu0 %v1431_v52 }
 0xcd2   : > { %v1430_v26 = vpop.xlane.xlu0 %1429 }
 0xcd3   : > { %v1434_v27 = vmul.f32 0.03125, %v1430_v26 }
 0xcd5   : > { %v1436_v8 = vsub.f32 %v1418_v18, %v1434_v27 }
 0xcd6   : > { %v1433_v24 = vpop.xlane.xlu0 %1432 }
 0xcd7   : > { %v1435_v28 = vmul.f32 0.03125, %v1433_v24  ;;  %v1438_v29 = vmul.f32 %v1436_v8, %v1436_v8 }
 0xcd9   : > { %v1437_v30 = vsub.f32 %v1419_v25, %v1435_v28  ;;  %v1440_v53 = vsel %vm548_vm1, %v1438_v29, 0.0 }
 0xcda   : > { %1441 = vadd.xlane.f32.xlu1 %v1440_v53 }
 0xcdb   : > { %v1439_v31 = vmul.f32 %v1437_v30, %v1437_v30 }
 0xcdd   : > { %v1443_v32 = vsel %vm548_vm1, %v1439_v31, 0.0 }
 0xcde   : > { %1444 = vadd.xlane.f32.xlu1 %v1443_v32 }
 0xd67   : > { %v1442_v36 = vpop.xlane.xlu1 %1441 }
 0xd68   : > { %v1446_v23 = vmul.f32 0.03125, %v1442_v36 }
 0xd6a   : > { %v1448_v37 = vadd.f32 1e-05, %v1446_v23 }
 0xd6b   : > { %v1445_v38 = vpop.xlane.xlu1 %1444 }
 0xd6c   : > { %2026 = vrsqrt.f32 %v1448_v37  ;;  %v1447_v39 = vmul.f32 0.03125, %v1445_v38 }
 0xd6e   : > { %v1449_v40 = vadd.f32 1e-05, %v1447_v39 }
 0xd70   : > { %2028 = vrsqrt.f32 %v1449_v40 }
 0xd76   : > { %v2027_v42 = vpop.eup %2026 }
 0xd77   : > { %v1452_v41 = vmul.f32 %v2027_v42, %v1436_v8 }
 0xd79   : > { %v1460_v46 = vmul.f32 %v1763_v43, %v1452_v41 }
 0xd7a   : > { %v2029_v44 = vpop.eup %2028 }
 0xd7b   : > { %v1453_v45 = vmul.f32 %v2029_v44, %v1437_v30  ;;  %v1468_v48 = vadd.f32 %v1764_v22, %v1460_v46 }
 0xd7d   : > { %v1461_v47 = vmul.f32 %v1763_v43, %v1453_v45 }
 0xd7f   : > { %v1469_v49 = vadd.f32 %v1764_v22, %v1461_v47 }
 0xd81   : > { %v1470_v50 = vpack.c.bf16 %v1469_v49, %v1468_v48 }
 0xd83   : > { %1902 = vmatmul.mubr.msk.bf16.vlgmr.msra.gmra.mrb[0].mxu0 %vm548_vm1, %v1470_v50 }
 0xe56   : > { %v1531_v54 = vpop.f32.mrb[0].mxu0 }
 0xe57   : > { %v1532_v55 = vadd.f32 %v1765_v51, %v1531_v54  ;;  %v1903_v56 = vpop.f32.mrb[1].mxu0 }
 0xe58   : > { %v1534_v58 = vpop.f32.mrb[2].mxu0 }
 0xe59   : > { %1538 = vst.msk [vmem:[#allocation3] sm:$0xff] %vm685_vm3, %v1532_v55  ;;  %v1535_v59 = vadd.f32 %v1765_v51, %v1534_v58  ;;  %v1904_v60 = vpop.f32.mrb[3].mxu0 }
 0xe5b   : > { %1539 = vst.msk [vmem:[#allocation3 + $0x8] sm:$0xff] %vm685_vm3, %v1535_v59 }
 0xe5c PF: > { %s2151_s18 = smov [#allocation3]  }
 0xe5d   : > { %s1554_s27 = sshll.u32 %s2151_s18, 4  ;;  %s1555_s27 = int_to_ptr.vmem [resolvable:$true] %s1554_s27 }
 0xe5e   : > { %s2030_s28 = scalar_lea.vmem %s1555_s27, 256  ;;  %p2037_p5 = scmp.lt.s32.totalorder %s1555_s27, %s1555_s27 }
 0xe5f   : > { %p2031_p0 = scmp.ne.s32.totalorder %s1555_s27, %s2030_s28  ;;  %p2038_p6 = scmp.lt.s32.totalorder %s2030_s28, %s2030_s28 }
 0xe61   : > { %p2032_p1 = pnand %p2031_p0, %p2257_p2  ;;  %p2039_p7 = por %p2038_p6, %p2037_p5 }
 0xe63   : > { %p2033_p3 = pneg %p2032_p1 }
 0xe65   : > { %p2040_p9 = pnand %p2039_p7, %p2033_p3 }
 0xe67   : > { %2043 = shalt.err (!%p2040_p9)
}
 0xe68   : > { %s2044_s23 = scalar_lea.hbm %s2621_s11, 256 }
 0xe69   : > { %p2045_p10 = scmp.ne.s32.totalorder %s2621_s11, %s2044_s23  ;;  %p2050_p13 = scmp.lt.u32.totalorder %s2044_s23, %s2621_s11 }
 0xe6b   : > { %p2046_p11 = pnand %p2045_p10, %p2257_p2 }
 0xe6d   : > { %p2047_p12 = pneg %p2046_p11 }
 0xe6f   : > { %p2052_p0 = pnand %p2050_p13, %p2047_p12 }
 0xe71   : > { %2055 = shalt.err (!%p2052_p0)
}
 0xe72   : > { %s2152_s21 = smov 128   ;;  %s2651_s16 = sld [smem:[#allocation10_spill]] }
 0xe73   : > { %s2153_s22 = smov 8   ;;  %s1771_s28 = sshll.u32 %s2130_s24, 6 }
 0xe74   : > { %1906 = dma.vmem_to_hbm [thread:$0]  (%p2257_p2), %s1555_s27, 256, %s2621_s11, [#allocation4], %s2152_s21, %s2152_s21, %s2153_s22  }
 0xe75   : > { %s2653_s23 = sld [smem:[#allocation19_spill]]  ;;  %s1572_s29 = sshll.u32 %s2312_s15, 4  ;;  %s2554_s29 = int_to_ptr.vmem [resolvable:$true] %s1572_s29 }
 0xe76   : > { %s2056_s0 = scalar_lea.vmem %s2554_s29, 128  ;;  %s2154_s24 = smov [#allocation5]  }
 0xe77   : > { %p2057_p1 = scmp.ne.s32.totalorder %s2554_s29, %s2056_s0  ;;  %s2060_s27 = sshll.u32 %s2154_s24, 4  ;;  %s2061_s27 = int_to_ptr.vmem [resolvable:$false] %s2060_s27 }
 0xe78   : > { %s2655_s30 = sand.u32 1, %s2651_s16   ;;  %s2062_s22 = scalar_lea.vmem %s2061_s27, 256 }
 0xe79   : > { %s2558_s19 = scalar_lea.sflag [#allocation6], %s2655_s30  ;;  %p2058_p3 = pnand %p2057_p1, %p2267_p4 }
 0xe7a   : > { %p2063_p6 = scmp.lt.s32.totalorder %s2554_s29, %s2061_s27  ;;  %p2064_p7 = scmp.lt.s32.totalorder %s2062_s22, %s2056_s0 }
 0xe7b   : > { %s2654_s14 = smov %s2653_s23  ;;  %s2551_s26 = scalar_lea.hbm %s2653_s23, %s1771_s28 }
 0xe7c   : > { %p2059_p5 = pneg %p2058_p3  ;;  %p2065_p9 = por %p2064_p7, %p2063_p6 }
 0xe7e   : > { %p2066_p10 = pnand %p2065_p9, %p2059_p5 }
 0xe80   : > { %2069 = shalt.err (!%p2066_p10)
}
 0xe81   : > { %s2070_s15 = scalar_lea.hbm %s2551_s26, 128  ;;  %s2074_s18 = scalar_lea.hbm %s2654_s14, 256 }
 0xe82   : > { %p2071_p11 = scmp.ne.s32.totalorder %s2551_s26, %s2070_s15  ;;  %p2075_p0 = scmp.lt.u32.totalorder %s2551_s26, %s2654_s14 }
 0xe83   : > { %p2076_p1 = scmp.lt.u32.totalorder %s2074_s18, %s2070_s15  ;;  %p2078_p5 = scmp.lt.u32.totalorder %s2070_s15, %s2551_s26 }
 0xe84   : > { %p2072_p12 = pnand %p2071_p11, %p2267_p4 }
 0xe85   : > { %p2077_p3 = por %p2076_p1, %p2075_p0 }
 0xe86   : > { %p2073_p13 = pneg %p2072_p12 }
 0xe87   : > { %p2079_p6 = por %p2078_p5, %p2077_p3 }
 0xe89   : > { %p2080_p7 = pnand %p2079_p6, %p2073_p13 }
 0xe8b   : > { %2083 = shalt.err (!%p2080_p7)
}
 0xe8c   : > { %s2155_s0 = smov 4   ;;  %s2656_s17 = smov 64  }
 0xe8d   : > { %1907 = dma.vmem_to_hbm [thread:$0]  (%p2267_p4), %s2554_s29, 128, %s2551_s26, %s2558_s19, %s2656_s17, %s2152_s21, %s2155_s0  }
 0xe8e   : > { %2109 = dma.done.wait (%p2257_p2), [#allocation4], 256  }
 0xe8f   : > { %2111 = vsyncadd (%p2257_p2), [#allocation4], 4294967040 }
 0xe90 PF: > { %s2657_s23 = sld [smem:[#allocation13_spill]]  ;;  %s2658_s30 = sld [smem:[#allocation9_spill]] }
 0xe96   : > { %p1917_p9 = scmp.ge.s32.totalorder %s2657_s23, 2  ;;  %s1591_s27 = sand.u32 1, %s2658_s30  }
 0xe97   : > { %s1592_s12 = scalar_lea.sflag [#allocation6], %s1591_s27 }
 0xe98   : > { %p1912_p10 = pnand %p1917_p9, %p2274_p8 }
 0xe9a   : > { %2113 = dma.done.wait (!%p1912_p10), %s1592_s12, 128  }
 0xe9b   : > { %2115 = vsyncadd (!%p1912_p10), %s1592_s12, 4294967168  ;;  %s27_s26 = sadd.s32 1, %s2657_s23   ;;  %s2660_s21 = sld [smem:[#allocation10_spill]] }
 0xe9c   : > { %p24_p11 = scmp.ge.s32.totalorder %s27_s26, 4   ;;  %s2661_s22 = sld [smem:[#allocation11_spill]] }
 0xe9d   : > { %s2662_s23 = sld [smem:[#allocation17_spill]]  ;;  %s2663_s24 = sld [smem:[#allocation12_spill]] }
 0xe9e   : > { %s2664_s25 = sld [smem:[#allocation14_spill]]  ;;  %26 = sbr.rel (!%p24_p11) target bundleno = 8 (0x8), region = 132 }
 0xea5   :  { %1597 = vsyncpa [#allocation4], 1 }
 0xea6   :  { %1599 = vsyncpa [#allocation4 + $0x1], 1 }
 0xea7   :  { %1600 = vsyncpa [#allocation6], 1 }
 0xea8   :  { %1602 = vsyncpa [#allocation6 + $0x1], 1 }

</bundles_post_ra>
